<compile_context>
chip_gen: v5e
topology: v5e:2x2
jax: 0.10.0
libtpu: 0.0.40
codegen_flags: <defaults>
</compile_context>

<pallas_src>
import numpy as np
import jax
import jax.numpy as jnp
from jax import lax
from jax.experimental import pallas as pl
from jax.experimental.pallas import tpu as pltpu

# ---------------------------------------------------------------------------
# Small-but-consistent configuration (input_channels = 3 * joints,
# intermediate_channels = input_channels // 3, as in the PyTorch module).
# ---------------------------------------------------------------------------
JOINTS = 4
INPUT_CHANNELS = 3 * JOINTS            # 12
INTERMEDIATE = INPUT_CHANNELS // 3     # 4
EMBEDDING_CHANNELS = 4
TIME_RANGE = 9                         # odd -> 'same' conv output length == TIME_RANGE
KEY_RANGE = 9.0
WINDOW = 2.0
TIME_SCALE = KEY_RANGE / TIME_RANGE
BATCH = 2
NFREQ = TIME_RANGE // 2 + 1            # rfft bins incl. DC (5)
TPI = float(np.float32(2.0 * np.pi))
BN_EPS = 1e-5

CIN_T = INPUT_CHANNELS * TIME_RANGE        # 108
INT_T = INTERMEDIATE * TIME_RANGE          # 36
EMB_T = EMBEDDING_CHANNELS * TIME_RANGE    # 36
EF = EMBEDDING_CHANNELS * NFREQ            # 20
E2 = 2 * EMBEDDING_CHANNELS                # 8
DB_W = 2 * EF + E2 + EMBEDDING_CHANNELS    # 52: [cos | sin | fc_x | fc_y | dc-sum]

LANES = 128                                # single parameter blob lane width


def _pad8(n):
    return ((n + 7) // 8) * 8


# --- single parameter blob: (ROWS, 128); 8-aligned row offsets --------------
OFF_W1T = 0                                # (CIN_T, INT_T)  conv1 Toeplitz
OFF_MBNI = OFF_W1T + _pad8(CIN_T)          # (INT_T, INT_T)  BN block-mean (intermediate)
OFF_MBNE = OFF_MBNI + _pad8(INT_T)         # (EMB_T, EMB_T)  BN block-mean (embedding)
OFF_W2T = OFF_MBNE + _pad8(EMB_T)          # (INT_T, EMB_T)  conv2 Toeplitz
OFF_WD1T = OFF_W2T + _pad8(INT_T)          # (EMB_T, INT_T)  deconv1 Toeplitz
OFF_WD2T = OFF_WD1T + _pad8(EMB_T)         # (INT_T, 128)    deconv2 Toeplitz (lane-padded)
OFF_DBIG = OFF_WD2T + _pad8(INT_T)         # (EMB_T, DB_W)   DFT + fc + dc-sum
OFF_SEL = OFF_DBIG + _pad8(EMB_T)          # (DB_W, 2E)      power/freq selector
OFF_GB = OFF_SEL + _pad8(DB_W)             # (6, *)          BN gammas/betas (bcast)
OFF_RREP = OFF_GB + _pad8(6)               # (E, EMB_T)      per-channel broadcast
OFF_ARGS = OFF_RREP + _pad8(EMBEDDING_CHANNELS)   # (1, EMB_T) args tiled per channel
OFF_D2B = OFF_ARGS + _pad8(1)              # (1, 128)        deconv2 bias (lane-padded)
OFF_FCGB = OFF_D2B + _pad8(1)              # (2, E2)         fc BN gamma/beta
ROWS = OFF_FCGB + _pad8(2)

# --- packed output layout: one 128-lane slot per logical output -------------
SLOT_Y = 0
SLOT_LAT = 128
SLOT_SIG = 256
SLOT_P = 384
SLOT_F = 512
SLOT_A = 640
SLOT_B = 768
OUT_W = 896


# ---------------------------------------------------------------------------
# In-kernel helpers
# ---------------------------------------------------------------------------
def _atan_f32(z):
    """float32 arctan from basic ops (Cephes-style range reduction + poly)."""
    az = jnp.abs(z)
    big = az > 2.414213562373095       # tan(3*pi/8)
    mid = az > 0.4142135623730951      # tan(pi/8)
    y0 = jnp.where(big, np.float32(np.pi / 2),
                   jnp.where(mid, np.float32(np.pi / 4), np.float32(0.0)))
    xr = jnp.where(big, -1.0 / az, jnp.where(mid, (az - 1.0) / (az + 1.0), az))
    zz = xr * xr
    poly = (((8.05374449538e-2 * zz - 1.38776856032e-1) * zz
             + 1.99777106478e-1) * zz - 3.33329491539e-1)
    res = y0 + xr + xr * zz * poly
    return jnp.where(z < 0, -res, res)


def _custom_atan2(y, x):
    """Mirrors Model.atan2: atan(y/x) with quadrant fix-ups using tpi."""
    # TODO(synk): x == 0 yields inf/NaN before the fix-up, same as the PyTorch
    # custom atan2 (diverges from torch.atan2 semantics only at x == 0).
    ans = _atan_f32(y / x)
    ans = jnp.where((x < 0) & (y >= 0), ans + 0.5 * TPI, ans)
    ans = jnp.where((x < 0) & (y < 0), ans - 0.5 * TPI, ans)
    return ans


# ---------------------------------------------------------------------------
# The Pallas kernel: whole PAE forward, single program, everything in VMEM.
# ---------------------------------------------------------------------------
def pae_kernel(x_ref, blob_ref, out_ref):
    f32 = jnp.float32
    B = BATCH
    E = EMBEDDING_CHANNELS

    x = x_ref[...]                                              # (B, CIN_T)

    # static, aligned views into the single packed parameter blob
    W1T = blob_ref[OFF_W1T:OFF_W1T + CIN_T, 0:INT_T]            # (108, 36)
    MBNI = blob_ref[OFF_MBNI:OFF_MBNI + INT_T, 0:INT_T]         # (36, 36)
    MBNE = blob_ref[OFF_MBNE:OFF_MBNE + EMB_T, 0:EMB_T]         # (36, 36)
    W2T = blob_ref[OFF_W2T:OFF_W2T + INT_T, 0:EMB_T]            # (36, 36)
    WD1T = blob_ref[OFF_WD1T:OFF_WD1T + EMB_T, 0:INT_T]         # (36, 36)
    WD2T = blob_ref[OFF_WD2T:OFF_WD2T + INT_T, :]               # (36, 128) lane-padded
    DBIG = blob_ref[OFF_DBIG:OFF_DBIG + EMB_T, 0:DB_W]          # (36, 52)
    SEL = blob_ref[OFF_SEL:OFF_SEL + DB_W, 0:E2]                # (52, 8)
    g1 = blob_ref[OFF_GB + 0:OFF_GB + 1, 0:INT_T]
    b1 = blob_ref[OFF_GB + 1:OFF_GB + 2, 0:INT_T]
    g2 = blob_ref[OFF_GB + 2:OFF_GB + 3, 0:EMB_T]
    b2 = blob_ref[OFF_GB + 3:OFF_GB + 4, 0:EMB_T]
    g3 = blob_ref[OFF_GB + 4:OFF_GB + 5, 0:INT_T]
    b3 = blob_ref[OFF_GB + 5:OFF_GB + 6, 0:INT_T]
    RREP = blob_ref[OFF_RREP:OFF_RREP + E, 0:EMB_T]             # (4, 36)
    targs = blob_ref[OFF_ARGS:OFF_ARGS + 1, 0:EMB_T]            # (1, 36)
    d2b = blob_ref[OFF_D2B:OFF_D2B + 1, :]                      # (1, 128) lane-padded
    FCG = blob_ref[OFF_FCGB + 0:OFF_FCGB + 1, 0:E2]             # (1, 8)
    FCB = blob_ref[OFF_FCGB + 1:OFF_FCGB + 2, 0:E2]             # (1, 8)

    def bn_ct(h, m_view, gamma, beta):
        # training-mode BatchNorm1d over (batch, time); h: (B, C*T) channel-major lanes.
        # One-pass moments via the block-mean matmul; E[x^2]-mean^2 variance is
        # fine for tanh-scale activations here.
        cs = jnp.sum(h, axis=0, keepdims=True)
        cs2 = jnp.sum(h * h, axis=0, keepdims=True)
        mom = jnp.dot(jnp.concatenate([cs, cs2], axis=0), m_view,
                      preferred_element_type=f32)                # (2, C*T)
        mean = mom[0:1, :]
        var = mom[1:2, :] - mean * mean                          # biased variance
        return (h - mean) * lax.rsqrt(var + BN_EPS) * gamma + beta

    # ------------------------------ encoder --------------------------------
    # Conv1d('same') == one block-Toeplitz matmul; conv bias cancelled by BN.
    h = jnp.dot(x, W1T, preferred_element_type=f32)              # (B, INT_T)
    h = jnp.tanh(bn_ct(h, MBNI, g1, b1))
    h = jnp.dot(h, W2T, preferred_element_type=f32)              # (B, EMB_T)
    latent = jnp.tanh(bn_ct(h, MBNE, g2, b2))
    out_ref[:, SLOT_LAT:SLOT_LAT + EMB_T] = latent               # vreg-aligned slot

    # -------- rfft (explicit DFT) + per-channel fc + DC-sum, one matmul -----
    riv = jnp.dot(latent, DBIG, preferred_element_type=f32)      # (B, 52)
    # power selector acts directly on riv^2 (no [power|real] lane concat):
    stats = jnp.dot(riv * riv, SEL, preferred_element_type=f32)  # (B, 8): [psum | fsum]
    psum = stats[:, 0:E]
    fsum = stats[:, E:E2]
    V = riv[:, 2 * EF:2 * EF + E2]                               # (B, 2E) fc out (bias cancels in BN)
    dc = riv[:, 2 * EF + E2:2 * EF + E2 + E]                     # (B, E)  real DC bin

    freq = fsum / psum * np.float32(1.0 / TIME_SCALE)            # exact division (matches PyTorch)
    amp = 2.0 * jnp.sqrt(psum) * np.float32(1.0 / TIME_RANGE)
    offs = dc * np.float32(1.0 / TIME_RANGE)

    # -------- per-channel BatchNorm1d(2) over batch + custom atan2 ---------
    vmean = jnp.mean(V, axis=0, keepdims=True)                   # (1, 2E)
    vdiff = V - vmean
    vvar = jnp.mean(vdiff * vdiff, axis=0, keepdims=True)        # biased variance
    Vn = vdiff * lax.rsqrt(vvar + BN_EPS) * FCG + FCB
    p = _custom_atan2(Vn[:, E:E2], Vn[:, 0:E]) * np.float32(1.0 / TPI)   # (B, E)

    out_ref[:, SLOT_P:SLOT_P + E] = p
    out_ref[:, SLOT_F:SLOT_F + E] = freq
    out_ref[:, SLOT_A:SLOT_A + E] = amp
    out_ref[:, SLOT_B:SLOT_B + E] = offs

    # --------------------- latent signal reconstruction --------------------
    fp = jnp.concatenate([freq, p, amp, offs], axis=0)           # (4B, E)
    fpb = jnp.dot(fp, RREP, preferred_element_type=f32)          # (4B, EMB_T) per-channel bcast
    f_bt = fpb[0:B]
    p_bt = fpb[B:2 * B]
    a_bt = fpb[2 * B:3 * B]
    o_bt = fpb[3 * B:4 * B]
    signal = a_bt * jnp.sin(np.float32(TPI) * (f_bt * targs + p_bt)) + o_bt   # (B, EMB_T)
    out_ref[:, SLOT_SIG:SLOT_SIG + EMB_T] = signal

    # ------------------------------ decoder --------------------------------
    d = jnp.dot(signal, WD1T, preferred_element_type=f32)        # (B, INT_T); bias cancelled by BN
    d = jnp.tanh(bn_ct(d, MBNI, g3, b3))
    y = jnp.dot(d, WD2T, preferred_element_type=f32) + d2b       # (B, 128); lanes 108.. are 0
    out_ref[:, SLOT_Y:SLOT_Y + LANES] = y                        # full unmasked store


# ---------------------------------------------------------------------------
# Host-side parameter construction (deterministic, PyTorch-shaped) + packing
# ---------------------------------------------------------------------------
def _conv_toeplitz(w):
    # w: PyTorch Conv1d weight (C_out, C_in, K), stride 1, 'same' zero padding.
    # Returns (C_in*T, C_out*T) so y_flat = x_flat @ W.
    c_out, c_in, k_sz = w.shape
    pad = (k_sz - 1) // 2
    t_rng = TIME_RANGE
    mat = np.zeros((c_in * t_rng, c_out * t_rng), np.float32)
    for co in range(c_out):
        for ci in range(c_in):
            for t in range(t_rng):
                for s in range(t_rng):
                    k = s - t + pad
                    if 0 <= k < k_sz:
                        mat[ci * t_rng + s, co * t_rng + t] = w[co, ci, k]
    return mat


def _bn_mean_matrix(channels, t_rng, batch):
    # (C*T, C*T): column-sum @ M == per-channel mean broadcast over that channel's T lanes.
    mat = np.zeros((channels * t_rng, channels * t_rng), np.float32)
    for c in range(channels):
        mat[c * t_rng:(c + 1) * t_rng, c * t_rng:(c + 1) * t_rng] = 1.0 / (batch * t_rng)
    return mat


def _dft_fc_dc_matrix(fcw):
    # fcw: (E, 2, T).  Columns: [cos (EF) | sin (EF) | fc_x (E) | fc_y (E) | dc-sum (E)].
    e_ch, _, t_rng = fcw.shape
    fb = NFREQ
    mat = np.zeros((e_ch * t_rng, 2 * e_ch * fb + 3 * e_ch), np.float64)
    t = np.arange(t_rng, dtype=np.float64)
    for e in range(e_ch):
        rows = slice(e * t_rng, (e + 1) * t_rng)
        for f in range(fb):
            ang = 2.0 * np.pi * t * f / t_rng
            mat[rows, e * fb + f] = np.cos(ang)
            mat[rows, e_ch * fb + e * fb + f] = np.sin(ang)
        mat[rows, 2 * e_ch * fb + e] = fcw[e, 0, :]               # fc x
        mat[rows, 2 * e_ch * fb + e_ch + e] = fcw[e, 1, :]        # fc y
        mat[rows, 2 * e_ch * fb + 2 * e_ch + e] = 1.0             # DC = sum over time
    return mat.astype(np.float32)


def _power_selector():
    # (DB_W, 2E) selector acting on riv*riv:
    #  cols 0..E-1: sum of (cos^2 + sin^2) over non-DC bins (== power sum);
    #  cols E..2E-1: freq-weighted power sum.
    e_ch, fb = EMBEDDING_CHANNELS, NFREQ
    freqs = np.fft.rfftfreq(TIME_RANGE)[1:] * (TIME_RANGE * TIME_SCALE) / WINDOW
    mat = np.zeros((DB_W, 2 * e_ch), np.float32)
    for e in range(e_ch):
        for f in range(1, fb):
            for base in (0, e_ch * fb):                           # cos block, sin block
                mat[base + e * fb + f, e] = 1.0
                mat[base + e * fb + f, e_ch + e] = freqs[f - 1]
    return mat


def _place(buf, row_off, arr):
    arr = np.asarray(arr, np.float32)
    if arr.ndim == 1:
        arr = arr[None, :]
    buf[row_off:row_off + arr.shape[0], :arr.shape[1]] = arr


def init_params(key):
    ks = jax.random.split(key, 8)

    def rnd(k, shape, fan_in):
        return np.asarray(jax.random.normal(k, shape, jnp.float32)) / np.float32(np.sqrt(fan_in))

    # PyTorch-shaped weights (Conv1d: (C_out, C_in, K); per-channel Linear: (E, 2, T)).
    c1w = rnd(ks[0], (INTERMEDIATE, INPUT_CHANNELS, TIME_RANGE), INPUT_CHANNELS * TIME_RANGE)
    c2w = rnd(ks[1], (EMBEDDING_CHANNELS, INTERMEDIATE, TIME_RANGE), INTERMEDIATE * TIME_RANGE)
    d1w = rnd(ks[2], (INTERMEDIATE, EMBEDDING_CHANNELS, TIME_RANGE), EMBEDDING_CHANNELS * TIME_RANGE)
    d2w = rnd(ks[3], (INPUT_CHANNELS, INTERMEDIATE, TIME_RANGE), INTERMEDIATE * TIME_RANGE)
    d2b = rnd(ks[4], (INPUT_CHANNELS,), INTERMEDIATE * TIME_RANGE)
    fcw = rnd(ks[5], (EMBEDDING_CHANNELS, 2, TIME_RANGE), TIME_RANGE)
    # conv1/conv2/deconv1 biases and the fc biases are cancelled exactly by the
    # training-mode BatchNorm mean subtraction that follows them -> omitted.

    blob = np.zeros((ROWS, LANES), np.float32)
    _place(blob, OFF_W1T, _conv_toeplitz(c1w))
    _place(blob, OFF_MBNI, _bn_mean_matrix(INTERMEDIATE, TIME_RANGE, BATCH))
    _place(blob, OFF_MBNE, _bn_mean_matrix(EMBEDDING_CHANNELS, TIME_RANGE, BATCH))
    _place(blob, OFF_W2T, _conv_toeplitz(c2w))
    _place(blob, OFF_WD1T, _conv_toeplitz(d1w))
    _place(blob, OFF_WD2T, _conv_toeplitz(d2w))          # 108 cols; lanes 108..127 stay 0
    _place(blob, OFF_DBIG, _dft_fc_dc_matrix(fcw))
    _place(blob, OFF_SEL, _power_selector())

    # BatchNorm affine params (PyTorch defaults: gamma=1, beta=0), broadcast per channel.
    _place(blob, OFF_GB + 0, np.ones(INT_T, np.float32))
    _place(blob, OFF_GB + 1, np.zeros(INT_T, np.float32))
    _place(blob, OFF_GB + 2, np.ones(EMB_T, np.float32))
    _place(blob, OFF_GB + 3, np.zeros(EMB_T, np.float32))
    _place(blob, OFF_GB + 4, np.ones(INT_T, np.float32))
    _place(blob, OFF_GB + 5, np.zeros(INT_T, np.float32))

    rrep = np.zeros((EMBEDDING_CHANNELS, EMB_T), np.float32)
    for e in range(EMBEDDING_CHANNELS):
        rrep[e, e * TIME_RANGE:(e + 1) * TIME_RANGE] = 1.0
    _place(blob, OFF_RREP, rrep)
    _place(blob, OFF_ARGS, np.tile(
        np.linspace(-WINDOW / 2, WINDOW / 2, TIME_RANGE, dtype=np.float32),
        EMBEDDING_CHANNELS))
    _place(blob, OFF_D2B, np.repeat(d2b, TIME_RANGE))    # 108 lanes; rest stay 0
    _place(blob, OFF_FCGB + 0, np.ones(E2, np.float32))
    _place(blob, OFF_FCGB + 1, np.zeros(E2, np.float32))
    return jnp.asarray(blob)


# ---------------------------------------------------------------------------
# Wrapper: mirrors Model.forward — flat x in, (y, latent, signal, params) out.
# ---------------------------------------------------------------------------
_MM_SHAPES = (
    (BATCH, CIN_T, INT_T),                       # conv1
    (2, INT_T, INT_T),                           # bn1 moments
    (BATCH, INT_T, EMB_T),                       # conv2
    (2, EMB_T, EMB_T),                           # bn2 moments
    (BATCH, EMB_T, DB_W),                        # DFT + fc + dc
    (BATCH, DB_W, E2),                           # power selector
    (4 * BATCH, EMBEDDING_CHANNELS, EMB_T),      # per-channel broadcast
    (BATCH, EMB_T, INT_T),                       # deconv1
    (2, INT_T, INT_T),                           # bn3 moments
    (BATCH, INT_T, LANES),                       # deconv2 (lane-padded)
)
_KERNEL_FLOPS = sum(2 * m * k * n for m, k, n in _MM_SHAPES) + 64 * BATCH * LANES
_KERNEL_TRANSCENDENTALS = BATCH * (2 * INT_T + EMB_T        # tanh
                                   + EMB_T                  # sin
                                   + 4 * EMBEDDING_CHANNELS)  # sqrt / div / rsqrt-ish
_KERNEL_BYTES = 4 * (BATCH * CIN_T + ROWS * LANES + BATCH * OUT_W)


def pae_forward(x_flat, blob):
    vmem = pltpu.MemorySpace.VMEM
    out = pl.pallas_call(
        pae_kernel,
        out_shape=jax.ShapeDtypeStruct((BATCH, OUT_W), jnp.float32),
        in_specs=[pl.BlockSpec(memory_space=vmem)] * 2,
        out_specs=pl.BlockSpec(memory_space=vmem),
        cost_estimate=pl.CostEstimate(
            flops=_KERNEL_FLOPS,
            transcendentals=_KERNEL_TRANSCENDENTALS,
            bytes_accessed=_KERNEL_BYTES),
    )(x_flat, blob)

    E = EMBEDDING_CHANNELS
    y = out[:, SLOT_Y:SLOT_Y + CIN_T]
    latent = out[:, SLOT_LAT:SLOT_LAT + EMB_T].reshape(BATCH, E, TIME_RANGE)
    signal = out[:, SLOT_SIG:SLOT_SIG + EMB_T].reshape(BATCH, E, TIME_RANGE)
    p = out[:, SLOT_P:SLOT_P + E].reshape(BATCH, E, 1)
    f = out[:, SLOT_F:SLOT_F + E].reshape(BATCH, E, 1)
    a = out[:, SLOT_A:SLOT_A + E].reshape(BATCH, E, 1)
    b = out[:, SLOT_B:SLOT_B + E].reshape(BATCH, E, 1)
    return y, latent, signal, (p, f, a, b)


if __name__ == "__main__":
    key = jax.random.PRNGKey(0)
    kx, kp = jax.random.split(key)
    x = jax.random.normal(kx, (BATCH, INPUT_CHANNELS * TIME_RANGE), jnp.float32)
    blob = init_params(kp)

    y, latent, signal, (p, f, a, b) = pae_forward(x, blob)
    jax.block_until_ready((y, latent, signal, p, f, a, b))

    assert y.shape == (BATCH, INPUT_CHANNELS * TIME_RANGE)
    assert latent.shape == (BATCH, EMBEDDING_CHANNELS, TIME_RANGE)
    assert signal.shape == (BATCH, EMBEDDING_CHANNELS, TIME_RANGE)
    assert p.shape == f.shape == a.shape == b.shape == (BATCH, EMBEDDING_CHANNELS, 1)
    print("KERNEL_OK")
</pallas_src>

<mosaic_0001>
module attributes {stable_mosaic.version = 11 : i64} {
  func.func @pae_kernel(%arg0: memref<2x108xf32, #tpu.memory_space<vmem>>, %arg1: memref<448x128xf32, #tpu.memory_space<vmem>>, %arg2: memref<2x896xf32, #tpu.memory_space<vmem>>) attributes {dimension_semantics = [], scalar_prefetch = 0 : i64, scratch_operands = 0 : i64, tpu.core_type = #tpu.core_type<tc>} {
    %c0 = arith.constant 0 : index
    %c0_0 = arith.constant 0 : index
    %0 = vector.load %arg0[%c0, %c0_0] : memref<2x108xf32, #tpu.memory_space<vmem>>, vector<2x108xf32>
    %c0_1 = arith.constant 0 : index
    %c0_2 = arith.constant 0 : index
    %1 = vector.load %arg1[%c0_1, %c0_2] : memref<448x128xf32, #tpu.memory_space<vmem>>, vector<108x36xf32>
    %c112 = arith.constant 112 : index
    %c0_3 = arith.constant 0 : index
    %2 = vector.load %arg1[%c112, %c0_3] : memref<448x128xf32, #tpu.memory_space<vmem>>, vector<36x36xf32>
    %c152 = arith.constant 152 : index
    %c0_4 = arith.constant 0 : index
    %3 = vector.load %arg1[%c152, %c0_4] : memref<448x128xf32, #tpu.memory_space<vmem>>, vector<36x36xf32>
    %c192 = arith.constant 192 : index
    %c0_5 = arith.constant 0 : index
    %4 = vector.load %arg1[%c192, %c0_5] : memref<448x128xf32, #tpu.memory_space<vmem>>, vector<36x36xf32>
    %c232 = arith.constant 232 : index
    %c0_6 = arith.constant 0 : index
    %5 = vector.load %arg1[%c232, %c0_6] : memref<448x128xf32, #tpu.memory_space<vmem>>, vector<36x36xf32>
    %c272 = arith.constant 272 : index
    %c0_7 = arith.constant 0 : index
    %6 = vector.load %arg1[%c272, %c0_7] : memref<448x128xf32, #tpu.memory_space<vmem>>, vector<36x128xf32>
    %c312 = arith.constant 312 : index
    %c0_8 = arith.constant 0 : index
    %7 = vector.load %arg1[%c312, %c0_8] : memref<448x128xf32, #tpu.memory_space<vmem>>, vector<36x52xf32>
    %c352 = arith.constant 352 : index
    %c0_9 = arith.constant 0 : index
    %8 = vector.load %arg1[%c352, %c0_9] : memref<448x128xf32, #tpu.memory_space<vmem>>, vector<52x8xf32>
    %c408 = arith.constant 408 : index
    %c0_10 = arith.constant 0 : index
    %9 = vector.load %arg1[%c408, %c0_10] : memref<448x128xf32, #tpu.memory_space<vmem>>, vector<1x36xf32>
    %c409 = arith.constant 409 : index
    %c0_11 = arith.constant 0 : index
    %10 = vector.load %arg1[%c409, %c0_11] : memref<448x128xf32, #tpu.memory_space<vmem>>, vector<1x36xf32>
    %c410 = arith.constant 410 : index
    %c0_12 = arith.constant 0 : index
    %11 = vector.load %arg1[%c410, %c0_12] : memref<448x128xf32, #tpu.memory_space<vmem>>, vector<1x36xf32>
    %c411 = arith.constant 411 : index
    %c0_13 = arith.constant 0 : index
    %12 = vector.load %arg1[%c411, %c0_13] : memref<448x128xf32, #tpu.memory_space<vmem>>, vector<1x36xf32>
    %c412 = arith.constant 412 : index
    %c0_14 = arith.constant 0 : index
    %13 = vector.load %arg1[%c412, %c0_14] : memref<448x128xf32, #tpu.memory_space<vmem>>, vector<1x36xf32>
    %c413 = arith.constant 413 : index
    %c0_15 = arith.constant 0 : index
    %14 = vector.load %arg1[%c413, %c0_15] : memref<448x128xf32, #tpu.memory_space<vmem>>, vector<1x36xf32>
    %c416 = arith.constant 416 : index
    %c0_16 = arith.constant 0 : index
    %15 = vector.load %arg1[%c416, %c0_16] : memref<448x128xf32, #tpu.memory_space<vmem>>, vector<4x36xf32>
    %c424 = arith.constant 424 : index
    %c0_17 = arith.constant 0 : index
    %16 = vector.load %arg1[%c424, %c0_17] : memref<448x128xf32, #tpu.memory_space<vmem>>, vector<1x36xf32>
    %c432 = arith.constant 432 : index
    %c0_18 = arith.constant 0 : index
    %17 = vector.load %arg1[%c432, %c0_18] : memref<448x128xf32, #tpu.memory_space<vmem>>, vector<1x128xf32>
    %c440 = arith.constant 440 : index
    %c0_19 = arith.constant 0 : index
    %18 = vector.load %arg1[%c440, %c0_19] : memref<448x128xf32, #tpu.memory_space<vmem>>, vector<1x8xf32>
    %c441 = arith.constant 441 : index
    %c0_20 = arith.constant 0 : index
    %19 = vector.load %arg1[%c441, %c0_20] : memref<448x128xf32, #tpu.memory_space<vmem>>, vector<1x8xf32>
    %cst = arith.constant dense<0.000000e+00> : vector<2x36xf32>
    %20 = tpu.matmul %0, %1, %cst {dimension_numbers = #tpu.dot_dimension_numbers<[1], [0], [0], [1], [0, 0, 1, 1], [], []>} : vector<2x108xf32>, vector<108x36xf32>, vector<2x36xf32> -> vector<2x36xf32>
    %cst_21 = arith.constant dense<0.000000e+00> : vector<36xf32>
    %21 = vector.multi_reduction <add>, %20, %cst_21 [0] : vector<2x36xf32> to vector<36xf32>
    %22 = vector.shape_cast %21 : vector<36xf32> to vector<1x36xf32>
    %23 = arith.mulf %20, %20 : vector<2x36xf32>
    %cst_22 = arith.constant dense<0.000000e+00> : vector<36xf32>
    %24 = vector.multi_reduction <add>, %23, %cst_22 [0] : vector<2x36xf32> to vector<36xf32>
    %25 = vector.shape_cast %24 : vector<36xf32> to vector<1x36xf32>
    %26 = tpu.concatenate %22, %25 in 0 : vector<1x36xf32>, vector<1x36xf32> -> vector<2x36xf32>
    %cst_23 = arith.constant dense<0.000000e+00> : vector<2x36xf32>
    %27 = tpu.matmul %26, %2, %cst_23 {dimension_numbers = #tpu.dot_dimension_numbers<[1], [0], [0], [1], [0, 0, 1, 1], [], []>} : vector<2x36xf32>, vector<36x36xf32>, vector<2x36xf32> -> vector<2x36xf32>
    %28 = vector.extract_strided_slice %27 {offsets = [0, 0], sizes = [1, 36], strides = [1, 1]} : vector<2x36xf32> to vector<1x36xf32>
    %29 = vector.extract_strided_slice %27 {offsets = [1, 0], sizes = [1, 36], strides = [1, 1]} : vector<2x36xf32> to vector<1x36xf32>
    %30 = arith.mulf %28, %28 : vector<1x36xf32>
    %31 = arith.subf %29, %30 : vector<1x36xf32>
    %32 = vector.broadcast %28 : vector<1x36xf32> to vector<2x36xf32>
    %33 = arith.subf %20, %32 : vector<2x36xf32>
    %cst_24 = arith.constant 9.99999974E-6 : f32
    %34 = vector.broadcast %cst_24 : f32 to vector<1x36xf32>
    %35 = arith.addf %31, %34 : vector<1x36xf32>
    %36 = math.rsqrt %35 : vector<1x36xf32>
    %37 = vector.broadcast %36 : vector<1x36xf32> to vector<2x36xf32>
    %38 = arith.mulf %33, %37 : vector<2x36xf32>
    %39 = vector.broadcast %9 : vector<1x36xf32> to vector<2x36xf32>
    %40 = arith.mulf %38, %39 : vector<2x36xf32>
    %41 = vector.broadcast %10 : vector<1x36xf32> to vector<2x36xf32>
    %42 = arith.addf %40, %41 : vector<2x36xf32>
    %43 = math.tanh %42 : vector<2x36xf32>
    %cst_25 = arith.constant dense<0.000000e+00> : vector<2x36xf32>
    %44 = tpu.matmul %43, %4, %cst_25 {dimension_numbers = #tpu.dot_dimension_numbers<[1], [0], [0], [1], [0, 0, 1, 1], [], []>} : vector<2x36xf32>, vector<36x36xf32>, vector<2x36xf32> -> vector<2x36xf32>
    %cst_26 = arith.constant dense<0.000000e+00> : vector<36xf32>
    %45 = vector.multi_reduction <add>, %44, %cst_26 [0] : vector<2x36xf32> to vector<36xf32>
    %46 = vector.shape_cast %45 : vector<36xf32> to vector<1x36xf32>
    %47 = arith.mulf %44, %44 : vector<2x36xf32>
    %cst_27 = arith.constant dense<0.000000e+00> : vector<36xf32>
    %48 = vector.multi_reduction <add>, %47, %cst_27 [0] : vector<2x36xf32> to vector<36xf32>
    %49 = vector.shape_cast %48 : vector<36xf32> to vector<1x36xf32>
    %50 = tpu.concatenate %46, %49 in 0 : vector<1x36xf32>, vector<1x36xf32> -> vector<2x36xf32>
    %cst_28 = arith.constant dense<0.000000e+00> : vector<2x36xf32>
    %51 = tpu.matmul %50, %3, %cst_28 {dimension_numbers = #tpu.dot_dimension_numbers<[1], [0], [0], [1], [0, 0, 1, 1], [], []>} : vector<2x36xf32>, vector<36x36xf32>, vector<2x36xf32> -> vector<2x36xf32>
    %52 = vector.extract_strided_slice %51 {offsets = [0, 0], sizes = [1, 36], strides = [1, 1]} : vector<2x36xf32> to vector<1x36xf32>
    %53 = vector.extract_strided_slice %51 {offsets = [1, 0], sizes = [1, 36], strides = [1, 1]} : vector<2x36xf32> to vector<1x36xf32>
    %54 = arith.mulf %52, %52 : vector<1x36xf32>
    %55 = arith.subf %53, %54 : vector<1x36xf32>
    %56 = vector.broadcast %52 : vector<1x36xf32> to vector<2x36xf32>
    %57 = arith.subf %44, %56 : vector<2x36xf32>
    %cst_29 = arith.constant 9.99999974E-6 : f32
    %58 = vector.broadcast %cst_29 : f32 to vector<1x36xf32>
    %59 = arith.addf %55, %58 : vector<1x36xf32>
    %60 = math.rsqrt %59 : vector<1x36xf32>
    %61 = vector.broadcast %60 : vector<1x36xf32> to vector<2x36xf32>
    %62 = arith.mulf %57, %61 : vector<2x36xf32>
    %63 = vector.broadcast %11 : vector<1x36xf32> to vector<2x36xf32>
    %64 = arith.mulf %62, %63 : vector<2x36xf32>
    %65 = vector.broadcast %12 : vector<1x36xf32> to vector<2x36xf32>
    %66 = arith.addf %64, %65 : vector<2x36xf32>
    %67 = math.tanh %66 : vector<2x36xf32>
    %c0_30 = arith.constant 0 : index
    %c128 = arith.constant 128 : index
    %68 = vector.load %arg2[%c0_30, %c128] : memref<2x896xf32, #tpu.memory_space<vmem>>, vector<2x36xf32>
    tpu.vector_store %arg2[%c0_30, %c128], %67 {strides = array<i32>} : memref<2x896xf32, #tpu.memory_space<vmem>>, vector<2x36xf32>,
    %cst_31 = arith.constant dense<0.000000e+00> : vector<2x52xf32>
    %69 = tpu.matmul %67, %7, %cst_31 {dimension_numbers = #tpu.dot_dimension_numbers<[1], [0], [0], [1], [0, 0, 1, 1], [], []>} : vector<2x36xf32>, vector<36x52xf32>, vector<2x52xf32> -> vector<2x52xf32>
    %70 = arith.mulf %69, %69 : vector<2x52xf32>
    %cst_32 = arith.constant dense<0.000000e+00> : vector<2x8xf32>
    %71 = tpu.matmul %70, %8, %cst_32 {dimension_numbers = #tpu.dot_dimension_numbers<[1], [0], [0], [1], [0, 0, 1, 1], [], []>} : vector<2x52xf32>, vector<52x8xf32>, vector<2x8xf32> -> vector<2x8xf32>
    %72 = vector.extract_strided_slice %71 {offsets = [0, 0], sizes = [2, 4], strides = [1, 1]} : vector<2x8xf32> to vector<2x4xf32>
    %73 = vector.extract_strided_slice %71 {offsets = [0, 4], sizes = [2, 4], strides = [1, 1]} : vector<2x8xf32> to vector<2x4xf32>
    %74 = vector.extract_strided_slice %69 {offsets = [0, 40], sizes = [2, 8], strides = [1, 1]} : vector<2x52xf32> to vector<2x8xf32>
    %75 = vector.extract_strided_slice %69 {offsets = [0, 48], sizes = [2, 4], strides = [1, 1]} : vector<2x52xf32> to vector<2x4xf32>
    %76 = arith.divf %73, %72 : vector<2x4xf32>
    %cst_33 = arith.constant 1.000000e+00 : f32
    %77 = vector.broadcast %cst_33 : f32 to vector<2x4xf32>
    %78 = arith.mulf %76, %77 : vector<2x4xf32>
    %79 = math.sqrt %72 : vector<2x4xf32>
    %cst_34 = arith.constant 2.000000e+00 : f32
    %80 = vector.broadcast %cst_34 : f32 to vector<2x4xf32>
    %81 = arith.mulf %80, %79 : vector<2x4xf32>
    %cst_35 = arith.constant 0.111111112 : f32
    %82 = vector.broadcast %cst_35 : f32 to vector<2x4xf32>
    %83 = arith.mulf %81, %82 : vector<2x4xf32>
    %cst_36 = arith.constant 0.111111112 : f32
    %84 = vector.broadcast %cst_36 : f32 to vector<2x4xf32>
    %85 = arith.mulf %75, %84 : vector<2x4xf32>
    %cst_37 = arith.constant dense<0.000000e+00> : vector<8xf32>
    %86 = vector.multi_reduction <add>, %74, %cst_37 [0] : vector<2x8xf32> to vector<8xf32>
    %87 = vector.shape_cast %86 : vector<8xf32> to vector<1x8xf32>
    %cst_38 = arith.constant 2.000000e+00 : f32
    %88 = vector.broadcast %cst_38 : f32 to vector<1x8xf32>
    %89 = arith.divf %87, %88 : vector<1x8xf32>
    %90 = vector.broadcast %89 : vector<1x8xf32> to vector<2x8xf32>
    %91 = arith.subf %74, %90 : vector<2x8xf32>
    %92 = arith.mulf %91, %91 : vector<2x8xf32>
    %cst_39 = arith.constant dense<0.000000e+00> : vector<8xf32>
    %93 = vector.multi_reduction <add>, %92, %cst_39 [0] : vector<2x8xf32> to vector<8xf32>
    %94 = vector.shape_cast %93 : vector<8xf32> to vector<1x8xf32>
    %cst_40 = arith.constant 2.000000e+00 : f32
    %95 = vector.broadcast %cst_40 : f32 to vector<1x8xf32>
    %96 = arith.divf %94, %95 : vector<1x8xf32>
    %cst_41 = arith.constant 9.99999974E-6 : f32
    %97 = vector.broadcast %cst_41 : f32 to vector<1x8xf32>
    %98 = arith.addf %96, %97 : vector<1x8xf32>
    %99 = math.rsqrt %98 : vector<1x8xf32>
    %100 = vector.broadcast %99 : vector<1x8xf32> to vector<2x8xf32>
    %101 = arith.mulf %91, %100 : vector<2x8xf32>
    %102 = vector.broadcast %18 : vector<1x8xf32> to vector<2x8xf32>
    %103 = arith.mulf %101, %102 : vector<2x8xf32>
    %104 = vector.broadcast %19 : vector<1x8xf32> to vector<2x8xf32>
    %105 = arith.addf %103, %104 : vector<2x8xf32>
    %106 = vector.extract_strided_slice %105 {offsets = [0, 4], sizes = [2, 4], strides = [1, 1]} : vector<2x8xf32> to vector<2x4xf32>
    %107 = vector.extract_strided_slice %105 {offsets = [0, 0], sizes = [2, 4], strides = [1, 1]} : vector<2x8xf32> to vector<2x4xf32>
    %108 = arith.divf %106, %107 : vector<2x4xf32>
    %109 = math.absf %108 : vector<2x4xf32>
    %cst_42 = arith.constant 2.41421366 : f32
    %110 = vector.broadcast %cst_42 : f32 to vector<2x4xf32>
    %111 = arith.cmpf ogt, %109, %110 : vector<2x4xf32>
    %cst_43 = arith.constant 0.414213568 : f32
    %112 = vector.broadcast %cst_43 : f32 to vector<2x4xf32>
    %113 = arith.cmpf ogt, %109, %112 : vector<2x4xf32>
    %cst_44 = arith.constant 0.785398185 : f32
    %cst_45 = arith.constant 0.000000e+00 : f32
    %114 = vector.broadcast %cst_44 : f32 to vector<2x4xf32>
    %115 = vector.broadcast %cst_45 : f32 to vector<2x4xf32>
    %116 = arith.select %113, %114, %115 : vector<2x4xi1>, vector<2x4xf32>
    %cst_46 = arith.constant 1.57079637 : f32
    %117 = vector.broadcast %cst_46 : f32 to vector<2x4xf32>
    %118 = arith.select %111, %117, %116 : vector<2x4xi1>, vector<2x4xf32>
    %cst_47 = arith.constant -1.000000e+00 : f32
    %119 = vector.broadcast %cst_47 : f32 to vector<2x4xf32>
    %120 = arith.divf %119, %109 : vector<2x4xf32>
    %cst_48 = arith.constant 1.000000e+00 : f32
    %121 = vector.broadcast %cst_48 : f32 to vector<2x4xf32>
    %122 = arith.subf %109, %121 : vector<2x4xf32>
    %cst_49 = arith.constant 1.000000e+00 : f32
    %123 = vector.broadcast %cst_49 : f32 to vector<2x4xf32>
    %124 = arith.addf %109, %123 : vector<2x4xf32>
    %125 = arith.divf %122, %124 : vector<2x4xf32>
    %126 = arith.select %113, %125, %109 : vector<2x4xi1>, vector<2x4xf32>
    %127 = arith.select %111, %120, %126 : vector<2x4xi1>, vector<2x4xf32>
    %128 = arith.mulf %127, %127 : vector<2x4xf32>
    %cst_50 = arith.constant 0.0805374458 : f32
    %129 = vector.broadcast %cst_50 : f32 to vector<2x4xf32>
    %130 = arith.mulf %129, %128 : vector<2x4xf32>
    %cst_51 = arith.constant 0.138776854 : f32
    %131 = vector.broadcast %cst_51 : f32 to vector<2x4xf32>
    %132 = arith.subf %130, %131 : vector<2x4xf32>
    %133 = arith.mulf %132, %128 : vector<2x4xf32>
    %cst_52 = arith.constant 0.199777111 : f32
    %134 = vector.broadcast %cst_52 : f32 to vector<2x4xf32>
    %135 = arith.addf %133, %134 : vector<2x4xf32>
    %136 = arith.mulf %135, %128 : vector<2x4xf32>
    %cst_53 = arith.constant 0.333329499 : f32
    %137 = vector.broadcast %cst_53 : f32 to vector<2x4xf32>
    %138 = arith.subf %136, %137 : vector<2x4xf32>
    %139 = arith.addf %118, %127 : vector<2x4xf32>
    %140 = arith.mulf %127, %128 : vector<2x4xf32>
    %141 = arith.mulf %140, %138 : vector<2x4xf32>
    %142 = arith.addf %139, %141 : vector<2x4xf32>
    %cst_54 = arith.constant 0.000000e+00 : f32
    %143 = vector.broadcast %cst_54 : f32 to vector<2x4xf32>
    %144 = arith.cmpf olt, %108, %143 : vector<2x4xf32>
    %cst_55 = arith.constant 0.000000e+00 : f32
    %145 = vector.broadcast %cst_55 : f32 to vector<2x4xf32>
    %146 = arith.subf %145, %142 : vector<2x4xf32>
    %147 = arith.select %144, %146, %142 : vector<2x4xi1>, vector<2x4xf32>
    %cst_56 = arith.constant 0.000000e+00 : f32
    %148 = vector.broadcast %cst_56 : f32 to vector<2x4xf32>
    %149 = arith.cmpf olt, %107, %148 : vector<2x4xf32>
    %cst_57 = arith.constant 0.000000e+00 : f32
    %150 = vector.broadcast %cst_57 : f32 to vector<2x4xf32>
    %151 = arith.cmpf oge, %106, %150 : vector<2x4xf32>
    %152 = arith.andi %149, %151 : vector<2x4xi1>
    %cst_58 = arith.constant 3.14159274 : f32
    %153 = vector.broadcast %cst_58 : f32 to vector<2x4xf32>
    %154 = arith.addf %147, %153 : vector<2x4xf32>
    %155 = arith.select %152, %154, %147 : vector<2x4xi1>, vector<2x4xf32>
    %cst_59 = arith.constant 0.000000e+00 : f32
    %156 = vector.broadcast %cst_59 : f32 to vector<2x4xf32>
    %157 = arith.cmpf olt, %107, %156 : vector<2x4xf32>
    %cst_60 = arith.constant 0.000000e+00 : f32
    %158 = vector.broadcast %cst_60 : f32 to vector<2x4xf32>
    %159 = arith.cmpf olt, %106, %158 : vector<2x4xf32>
    %160 = arith.andi %157, %159 : vector<2x4xi1>
    %cst_61 = arith.constant 3.14159274 : f32
    %161 = vector.broadcast %cst_61 : f32 to vector<2x4xf32>
    %162 = arith.subf %155, %161 : vector<2x4xf32>
    %163 = arith.select %160, %162, %155 : vector<2x4xi1>, vector<2x4xf32>
    %cst_62 = arith.constant 0.159154937 : f32
    %164 = vector.broadcast %cst_62 : f32 to vector<2x4xf32>
    %165 = arith.mulf %163, %164 : vector<2x4xf32>
    %c0_63 = arith.constant 0 : index
    %c384 = arith.constant 384 : index
    %166 = vector.load %arg2[%c0_63, %c384] : memref<2x896xf32, #tpu.memory_space<vmem>>, vector<2x4xf32>
    tpu.vector_store %arg2[%c0_63, %c384], %165 {strides = array<i32>} : memref<2x896xf32, #tpu.memory_space<vmem>>, vector<2x4xf32>,
    %c0_64 = arith.constant 0 : index
    %c512 = arith.constant 512 : index
    %167 = vector.load %arg2[%c0_64, %c512] : memref<2x896xf32, #tpu.memory_space<vmem>>, vector<2x4xf32>
    tpu.vector_store %arg2[%c0_64, %c512], %78 {strides = array<i32>} : memref<2x896xf32, #tpu.memory_space<vmem>>, vector<2x4xf32>,
    %c0_65 = arith.constant 0 : index
    %c640 = arith.constant 640 : index
    %168 = vector.load %arg2[%c0_65, %c640] : memref<2x896xf32, #tpu.memory_space<vmem>>, vector<2x4xf32>
    tpu.vector_store %arg2[%c0_65, %c640], %83 {strides = array<i32>} : memref<2x896xf32, #tpu.memory_space<vmem>>, vector<2x4xf32>,
    %c0_66 = arith.constant 0 : index
    %c768 = arith.constant 768 : index
    %169 = vector.load %arg2[%c0_66, %c768] : memref<2x896xf32, #tpu.memory_space<vmem>>, vector<2x4xf32>
    tpu.vector_store %arg2[%c0_66, %c768], %85 {strides = array<i32>} : memref<2x896xf32, #tpu.memory_space<vmem>>, vector<2x4xf32>,
    %170 = tpu.concatenate %78, %165, %83, %85 in 0 : vector<2x4xf32>, vector<2x4xf32>, vector<2x4xf32>, vector<2x4xf32> -> vector<8x4xf32>
    %cst_67 = arith.constant dense<0.000000e+00> : vector<8x36xf32>
    %171 = tpu.matmul %170, %15, %cst_67 {dimension_numbers = #tpu.dot_dimension_numbers<[1], [0], [0], [1], [0, 0, 1, 1], [], []>} : vector<8x4xf32>, vector<4x36xf32>, vector<8x36xf32> -> vector<8x36xf32>
    %172 = vector.extract_strided_slice %171 {offsets = [0, 0], sizes = [2, 36], strides = [1, 1]} : vector<8x36xf32> to vector<2x36xf32>
    %173 = vector.extract_strided_slice %171 {offsets = [2, 0], sizes = [2, 36], strides = [1, 1]} : vector<8x36xf32> to vector<2x36xf32>
    %174 = vector.extract_strided_slice %171 {offsets = [4, 0], sizes = [2, 36], strides = [1, 1]} : vector<8x36xf32> to vector<2x36xf32>
    %175 = vector.extract_strided_slice %171 {offsets = [6, 0], sizes = [2, 36], strides = [1, 1]} : vector<8x36xf32> to vector<2x36xf32>
    %176 = vector.broadcast %16 : vector<1x36xf32> to vector<2x36xf32>
    %177 = arith.mulf %172, %176 : vector<2x36xf32>
    %178 = arith.addf %177, %173 : vector<2x36xf32>
    %cst_68 = arith.constant 6.28318548 : f32
    %179 = vector.broadcast %cst_68 : f32 to vector<2x36xf32>
    %180 = arith.mulf %179, %178 : vector<2x36xf32>
    %181 = math.sin %180 : vector<2x36xf32>
    %182 = arith.mulf %174, %181 : vector<2x36xf32>
    %183 = arith.addf %182, %175 : vector<2x36xf32>
    %c0_69 = arith.constant 0 : index
    %c256 = arith.constant 256 : index
    %184 = vector.load %arg2[%c0_69, %c256] : memref<2x896xf32, #tpu.memory_space<vmem>>, vector<2x36xf32>
    tpu.vector_store %arg2[%c0_69, %c256], %183 {strides = array<i32>} : memref<2x896xf32, #tpu.memory_space<vmem>>, vector<2x36xf32>,
    %cst_70 = arith.constant dense<0.000000e+00> : vector<2x36xf32>
    %185 = tpu.matmul %183, %5, %cst_70 {dimension_numbers = #tpu.dot_dimension_numbers<[1], [0], [0], [1], [0, 0, 1, 1], [], []>} : vector<2x36xf32>, vector<36x36xf32>, vector<2x36xf32> -> vector<2x36xf32>
    %cst_71 = arith.constant dense<0.000000e+00> : vector<36xf32>
    %186 = vector.multi_reduction <add>, %185, %cst_71 [0] : vector<2x36xf32> to vector<36xf32>
    %187 = vector.shape_cast %186 : vector<36xf32> to vector<1x36xf32>
    %188 = arith.mulf %185, %185 : vector<2x36xf32>
    %cst_72 = arith.constant dense<0.000000e+00> : vector<36xf32>
    %189 = vector.multi_reduction <add>, %188, %cst_72 [0] : vector<2x36xf32> to vector<36xf32>
    %190 = vector.shape_cast %189 : vector<36xf32> to vector<1x36xf32>
    %191 = tpu.concatenate %187, %190 in 0 : vector<1x36xf32>, vector<1x36xf32> -> vector<2x36xf32>
    %cst_73 = arith.constant dense<0.000000e+00> : vector<2x36xf32>
    %192 = tpu.matmul %191, %2, %cst_73 {dimension_numbers = #tpu.dot_dimension_numbers<[1], [0], [0], [1], [0, 0, 1, 1], [], []>} : vector<2x36xf32>, vector<36x36xf32>, vector<2x36xf32> -> vector<2x36xf32>
    %193 = vector.extract_strided_slice %192 {offsets = [0, 0], sizes = [1, 36], strides = [1, 1]} : vector<2x36xf32> to vector<1x36xf32>
    %194 = vector.extract_strided_slice %192 {offsets = [1, 0], sizes = [1, 36], strides = [1, 1]} : vector<2x36xf32> to vector<1x36xf32>
    %195 = arith.mulf %193, %193 : vector<1x36xf32>
    %196 = arith.subf %194, %195 : vector<1x36xf32>
    %197 = vector.broadcast %193 : vector<1x36xf32> to vector<2x36xf32>
    %198 = arith.subf %185, %197 : vector<2x36xf32>
    %cst_74 = arith.constant 9.99999974E-6 : f32
    %199 = vector.broadcast %cst_74 : f32 to vector<1x36xf32>
    %200 = arith.addf %196, %199 : vector<1x36xf32>
    %201 = math.rsqrt %200 : vector<1x36xf32>
    %202 = vector.broadcast %201 : vector<1x36xf32> to vector<2x36xf32>
    %203 = arith.mulf %198, %202 : vector<2x36xf32>
    %204 = vector.broadcast %13 : vector<1x36xf32> to vector<2x36xf32>
    %205 = arith.mulf %203, %204 : vector<2x36xf32>
    %206 = vector.broadcast %14 : vector<1x36xf32> to vector<2x36xf32>
    %207 = arith.addf %205, %206 : vector<2x36xf32>
    %208 = math.tanh %207 : vector<2x36xf32>
    %cst_75 = arith.constant dense<0.000000e+00> : vector<2x128xf32>
    %209 = tpu.matmul %208, %6, %cst_75 {dimension_numbers = #tpu.dot_dimension_numbers<[1], [0], [0], [1], [0, 0, 1, 1], [], []>} : vector<2x36xf32>, vector<36x128xf32>, vector<2x128xf32> -> vector<2x128xf32>
    %210 = vector.broadcast %17 : vector<1x128xf32> to vector<2x128xf32>
    %211 = arith.addf %209, %210 : vector<2x128xf32>
    %c0_76 = arith.constant 0 : index
    %c0_77 = arith.constant 0 : index
    %212 = vector.load %arg2[%c0_76, %c0_77] : memref<2x896xf32, #tpu.memory_space<vmem>>, vector<2x128xf32>
    tpu.vector_store %arg2[%c0_76, %c0_77], %211 {strides = array<i32>} : memref<2x896xf32, #tpu.memory_space<vmem>>, vector<2x128xf32>,
    return
  }
}

</mosaic_0001>

<bundles_post_ra>
// kernel: tpu_custom_call.1
= control target key start
LH: loop header
LB: loop body
LE: loop exit
PB: predicated region body
PF: predicated region fallthrough
CT: control target
= control target key end

     0   :  { %7 = vsyncpa [#allocation3], 0  ;;  %s1280_s0 = inlined_call_operand.hbm [shape: f32[2,108], index: 0, kind: input, shape index: {}]   ;;  %s1281_s1 = inlined_call_operand.hbm [shape: f32[448,128], index: 1, kind: input, shape index: {}]   ;;  %s1282_s2 = inlined_call_operand.hbm [shape: f32[2,896], index: 2, kind: output, shape index: {}]  }
   0x1   :  { %8 = vsyncpa [#allocation6], 0 }
   0x2   :  { %9 = vsyncpa [#allocation4], 0  ;;  %s15_s11 = sshll.u32 %s1280_s0, 4  ;;  %s1067_s12 = smov [#allocation2]   ;;  %s16_s11 = int_to_ptr.hbm [resolvable:$true] %s15_s11 }
   0x3   :  { %s17_s13 = sshll.u32 %s1067_s12, 4  ;;  %s25_s16 = sshll.u32 %s1281_s1, 4  ;;  %s18_s13 = int_to_ptr.vmem [resolvable:$true] %s17_s13  ;;  %s26_s16 = int_to_ptr.hbm [resolvable:$true] %s25_s16 }
   0x4   :  { %20 = dma.hbm_to_vmem [thread:$0]  %s16_s11, 32, %s18_s13, [#allocation3]  }
   0x5   :  { %s1068_s17 = smov [#allocation5]   ;;  %s1069_s19 = smov 128  }
   0x6   :  { %s27_s18 = sshll.u32 %s1068_s17, 4  ;;  %s1070_s20 = smov 8   ;;  %s28_s18 = int_to_ptr.vmem [resolvable:$true] %s27_s18 }
   0x7   :  { %33 = dma.hbm_to_vmem [thread:$0]  %s26_s16, 7168, %s28_s18, [#allocation6], %s1069_s19, %s1069_s19, %s1070_s20  }
   0x8   :  { %1061 = dma.done.wait [#allocation3], 32  }
   0x9   :  { %1062 = vsyncadd [#allocation3], 4294967264 }
   0xa   :  { %1063 = dma.done.wait [#allocation6], 7168  }
   0xb   :  { %1064 = vsyncadd [#allocation6], 4294960128  ;;  %vm109_vm0 = vcmask 1043456   ;;  %v56_v0 = vld [vmem:[#allocation5 + $0x68] sm:$0xf]  ;;  %v55_v1 = vld [vmem:[#allocation5 + $0x60] sm:$0xff] }
   0xc   :  { %905 = vmatpush.msk.msra.mxu0 %vm109_vm0, %v56_v0  ;;  %v54_v2 = vld [vmem:[#allocation5 + $0x58] sm:$0xff]  ;;  %v53_v3 = vld [vmem:[#allocation5 + $0x50] sm:$0xff]  ;;  %v52_v4 = vld [vmem:[#allocation5 + $0x48] sm:$0xff]  ;;  %vm105_vm1 = vcmask 883712   ;;  %vm133_vm2 = vcmask 287744   ;;  %vm149_vm3 = vcmask 1040384  }
   0xd   :  { %v51_v5 = vld [vmem:[#allocation5 + $0x40] sm:$0xff]  ;;  %v50_v6 = vld [vmem:[#allocation5 + $0x38] sm:$0xff]  ;;  %v49_v7 = vld [vmem:[#allocation5 + $0x30] sm:$0xff]  ;;  %vm151_vm4 = vcmask 293888   ;;  %s1071_s0 = smov 40   ;;  %vm385_vm11 = vcmask 386368  }
   0xe   :  { %116 = vmatpush.msra.mxu0 %v55_v1  ;;  %v48_v8 = vld [vmem:[#allocation5 + $0x28] sm:$0xff]  ;;  %v47_v9 = vld [vmem:[#allocation5 + $0x20] sm:$0xff]  ;;  %v46_v10 = vld [vmem:[#allocation5 + $0x18] sm:$0xff]  ;;  %vm324_vm12 = vcmask 424960   ;;  %s1073_s1 = smov 4   ;;  %s1075_s21 = smov 124  }
   0xf   :  { %v45_v11 = vld [vmem:[#allocation5 + $0x10] sm:$0xff]  ;;  %v44_v12 = vld [vmem:[#allocation5 + $0x8] sm:$0xff]  ;;  %v43_v13 = vld [vmem:[#allocation5] sm:$0xff]  ;;  %s1076_s22 = smov 84   ;;  %s1078_s23 = smov 88  }
  0x10   :  { %117 = vmatpush.msra.mxu0 %v54_v2  ;;  %v42_v14 = vld [vmem:[#allocation2] sm:$0x3]  ;;  %v1110_v15 = vld [vmem:[#allocation5 + $0x90] sm:$0xf]  ;;  %v1114_v16 = vld [vmem:[#allocation5 + $0x88] sm:$0xff]  ;;  %s1079_s24 = smov 92  }
  0x11   :  { %907 = vmatpush.msk.msra.mxu1 %vm109_vm0, %v1110_v15  ;;  %v1117_v17 = vld [vmem:[#allocation5 + $0x80] sm:$0xff]  ;;  %v1119_v18 = vld [vmem:[#allocation5 + $0x78] sm:$0xff]  ;;  %v1122_v19 = vld [vmem:[#allocation5 + $0x70] sm:$0xff]  ;;  %s1080_s25 = smov 80   ;;  %s1087_s26 = smov [#allocation7]  }
  0x12   :  { %118 = vmatpush.msra.mxu0 %v53_v3  ;;  %v71_v38 = vld [vmem:[#allocation5 + $0xe0] sm:$0xf]  ;;  %v70_v40 = vld [vmem:[#allocation5 + $0xd8] sm:$0xff]  ;;  %v69_v42 = vld [vmem:[#allocation5 + $0xd0] sm:$0xff]  ;;  %s892_s27 = sshll.u32 %s1087_s26, 4  ;;  %s894_s30 = sshll.u32 %s1282_s2, 4  ;;  %s893_s27 = int_to_ptr.vmem [resolvable:$true] %s892_s27  ;;  %s895_s30 = int_to_ptr.hbm [resolvable:$true] %s894_s30 }
  0x13   :  { %170 = vmatpush.msra.mxu1 %v1114_v16  ;;  %909 = vmatpush.msk.msra.mxu2 %vm109_vm0, %v71_v38  ;;  %v68_v43 = vld [vmem:[#allocation5 + $0xc8] sm:$0xff]  ;;  %v67_v45 = vld [vmem:[#allocation5 + $0xc0] sm:$0xff]  ;;  %v953_v57 = vld [vmem:[#allocation5 + $0x198] ss:$0 sm:$0xff] }
  0x14   :  { %119 = vmatpush.msra.mxu0 %v52_v4  ;;  %v954_v59 = vld [vmem:[#allocation5 + $0x199] ss:$0 sm:$0xff]  ;;  %v65_v0 = vld [vmem:[#allocation5 + $0xb0] sm:$0xff]  ;;  %v64_v1 = vld [vmem:[#allocation5 + $0xa8] sm:$0xff] }
  0x15   :  { %171 = vmatpush.msra.mxu1 %v1117_v17  ;;  %221 = vmatpush.msra.mxu2 %v70_v40  ;;  %v66_v63 = vld [vmem:[#allocation5 + $0xb8] sm:$0xf]  ;;  %v63_v2 = vld [vmem:[#allocation5 + $0xa0] sm:$0xff]  ;;  %v92_v38 = vld [vmem:[#allocation5 + $0x188] sm:$0xff] }
  0x16   :  { %120 = vmatpush.msra.mxu0 %v51_v5  ;;  %911 = vmatpush.msk.msra.mxu3 %vm109_vm0, %v66_v63  ;;  %v62_v3 = vld [vmem:[#allocation5 + $0x98] sm:$0xff] }
  0x17   :  { %172 = vmatpush.msra.mxu1 %v1119_v18  ;;  %222 = vmatpush.msra.mxu2 %v69_v42  ;;  %v90_v40 = vld [vmem:[#allocation5 + $0x178] sm:$0xff] }
  0x18   :  { %121 = vmatpush.msra.mxu0 %v50_v6  ;;  %263 = vmatpush.msra.mxu3 %v65_v0 }
  0x19   :  { %173 = vmatpush.msra.mxu1 %v1122_v19  ;;  %223 = vmatpush.msra.mxu2 %v68_v43  ;;  %v958_v43 = vld [vmem:[#allocation5 + $0x1b9] ss:$0 sm:$0xff] }
  0x1a   :  { %122 = vmatpush.msra.mxu0 %v49_v7  ;;  %264 = vmatpush.msra.mxu3 %v64_v1 }
  0x1b   :  { %224 = vmatpush.msra.mxu2 %v67_v45 }
  0x1c   :  { %123 = vmatpush.msra.mxu0 %v48_v8  ;;  %265 = vmatpush.msra.mxu3 %v63_v2 }
  0x1e   :  { %124 = vmatpush.msra.mxu0 %v47_v9  ;;  %266 = vmatpush.msra.mxu3 %v62_v3 }
  0x20   :  { %125 = vmatpush.msra.mxu0 %v46_v10 }
  0x22   :  { %126 = vmatpush.msra.mxu0 %v45_v11 }
  0x24   :  { %127 = vmatpush.msra.mxu0 %v44_v12 }
  0x26   :  { %128 = vmatpush.msra.mxu0 %v43_v13 }
  0x27   :  { %906 = vmatmul.msk.f32.vlgmr.msra.gmra.mxu0 %vm105_vm1, %v42_v14 }
  0xa4   :  { %v130_v20 = vpop.f32.mrf.mxu0 }
  0xa5   :  { %v134_v21 = vsel %vm133_vm2, %v130_v20, 0.0  ;;  %v141_v22 = vmul.f32 %v130_v20, %v130_v20 }
  0xa6   :  { %v135_v23 = vrot.slane %v134_v21, 4 }
  0xa7   :  { %v142_v24 = vsel %vm133_vm2, %v141_v22, 0.0 }
  0xa8   :  { %v136_v25 = vadd.f32 %v135_v23, %v134_v21  ;;  %v143_v26 = vrot.slane %v142_v24, 4 }
  0xaa   :  { %v137_v27 = vrot.slane %v136_v25, 2  ;;  %v144_v28 = vadd.f32 %v143_v26, %v142_v24 }
  0xac   :  { %v138_v29 = vadd.f32 %v137_v27, %v136_v25  ;;  %v145_v30 = vrot.slane %v144_v28, 2  ;;  %v86_v27 = vld [vmem:[#allocation5 + $0x158] sm:$0xf] }
  0xad   :  { %913 = vmatpush.msk.msrb.mxu1 %vm109_vm0, %v86_v27 }
  0xae   :  { %v139_v31 = vrot.slane %v138_v29, 1  ;;  %v146_v32 = vadd.f32 %v145_v30, %v144_v28 }
  0xb0   :  { %v147_v33 = vrot.slane %v146_v32, 1  ;;  %v140_v34 = vadd.f32 %v139_v31, %v138_v29  ;;  %v85_v29 = vld [vmem:[#allocation5 + $0x150] sm:$0xff]  ;;  %v84_v31 = vld [vmem:[#allocation5 + $0x148] sm:$0xff] }
  0xb1   :  { %315 = vmatpush.msrb.mxu1 %v85_v29 }
  0xb2   :  { %v148_v35 = vadd.f32 %v147_v33, %v146_v32  ;;  %v83_v33 = vld [vmem:[#allocation5 + $0x140] sm:$0xff] }
  0xb3   :  { %316 = vmatpush.msrb.mxu1 %v84_v31 }
  0xb4   :  { %v150_v36 = vsel %vm149_vm3, %v140_v34, %v148_v35  ;;  %v82_v35 = vld [vmem:[#allocation5 + $0x138] sm:$0xff] }
  0xb5   :  { %908 = vmatmul.msk.f32.vlgmr.msra.gmra.mxu1 %vm151_vm4, %v150_v36  ;;  %v957_v36 = vld [vmem:[#allocation5 + $0x1b8] ss:$0 sm:$0xff] }
  0xb6   :  { %317 = vmatpush.msrb.mxu1 %v83_v33  ;;  %425 = vrot.lane.b32.xlu0 %v957_v36, %s1071_s0 }
  0xb8   :  { %318 = vmatpush.msrb.mxu1 %v82_v35 }
  0xba   :  { %928 = vmatpush.msk.msra.mxu1 %vm109_vm0, %v1110_v15 }
  0xbc   :  { %826 = vmatpush.msra.mxu1 %v1114_v16 }
  0xbe   :  { %827 = vmatpush.msra.mxu1 %v1117_v17  ;;  %431 = vrot.lane.b32.xlu0 %v958_v43, %s1071_s0 }
  0xc0   :  { %828 = vmatpush.msra.mxu1 %v1119_v18  ;;  %v956_v18 = vld [vmem:[#allocation5 + $0x19b] ss:$0 sm:$0xff] }
  0xc2   :  { %829 = vmatpush.msra.mxu1 %v1122_v19 }
 0x128   :  { %v426_v27 = vpop.permute.xlu0 %425 }
 0x132   :  { %v175_v37 = vpop.f32.mrf.mxu1 }
 0x133   :  { %v178_v39 = vmul.f32 %v175_v37, %v175_v37  ;;  %v183_v52 = vperm.slane %v175_v37, 0 }
 0x135   :  { %v180_v41 = vrot.slane %v178_v39, 7  ;;  %v184_v55 = vsub.f32 %v130_v20, %v183_v52  ;;  %v91_v39 = vld [vmem:[#allocation5 + $0x180] sm:$0xff] }
 0x137   :  { %v182_v44 = vsub.f32 %v175_v37, %v180_v41  ;;  %v93_v37 = vld [vmem:[#allocation5 + $0x190] sm:$0xf] }
 0x138   :  { %915 = vmatpush.msk.msrb.mxu2 %vm109_vm0, %v93_v37  ;;  %v1074_v37 = vmov 0  }
 0x139   :  { %v185_v46 = vadd.f32 1e-05, %v182_v44  ;;  %v89_v44 = vld [vmem:[#allocation5 + $0x170] sm:$0xff] }
 0x13a   :  { %341 = vmatpush.msrb.mxu2 %v92_v38 }
 0x13b   :  { %963 = vrsqrt.f32 %v185_v46  ;;  %vm192_vm6 = vweird.f32 %v185_v46 }
 0x13c   :  { %342 = vmatpush.msrb.mxu2 %v91_v39 }
 0x13e   :  { %343 = vmatpush.msrb.mxu2 %v90_v40 }
 0x140   :  { %344 = vmatpush.msrb.mxu2 %v89_v44 }
 0x141   :  { %v964_v47 = vpop.eup %963 }
 0x142   :  { %v187_v48 = vmul.f32 %v964_v47, %v185_v46  ;;  %vm193_vm5 = vweird.f32 %v964_v47 }
 0x143   :  { %vm194_vm7 = vmor %vm192_vm6, %vm193_vm5 }
 0x144   :  { %v188_v49 = vmul.f32 %v964_v47, %v187_v48 }
 0x146   :  { %v189_v50 = vmul.f32 0.5, %v188_v49 }
 0x148   :  { %v190_v51 = vsub.f32 1.5, %v189_v50  ;;  %v955_v50 = vld [vmem:[#allocation5 + $0x19a] ss:$0 sm:$0xff] }
 0x14a   :  { %v191_v53 = vmul.f32 %v964_v47, %v190_v51 }
 0x14c   :  { %v195_v54 = vsel %vm194_vm7, %v964_v47, %v191_v53 }
 0x14d   :  { %v196_v56 = vperm.slane %v195_v54, 1  ;;  %v88_v54 = vld [vmem:[#allocation5 + $0x168] sm:$0xff] }
 0x14e   :  { %345 = vmatpush.msrb.mxu2 %v88_v54 }
 0x14f   :  { %v197_v58 = vmul.f32 %v196_v56, %v184_v55  ;;  %v87_v55 = vld [vmem:[#allocation5 + $0x160] sm:$0xff]  ;;  %v1072_v56 = vmov 2.0  }
 0x150   :  { %346 = vmatpush.msrb.mxu2 %v87_v55 }
 0x151   :  { %v199_v60 = vmul.f32 %v953_v57, %v197_v58 }
 0x153   :  { %v201_v61 = vadd.f32 %v954_v59, %v199_v60 }
 0x155   :  { %965 = vtanh.f32 %v201_v61 }
 0x15b   :  { %v966_v62 = vpop.eup %965 }
 0x15c   :  { %910 = vmatmul.msk.f32.vlgmr.msra.gmra.mxu2 %vm151_vm4, %v966_v62 }
 0x1df   :  { %v1133_v4 = vpop.f32.mrf.mxu2 }
 0x1e0   :  { %v229_v5 = vsel %vm133_vm2, %v1133_v4, 0.0  ;;  %v236_v6 = vmul.f32 %v1133_v4, %v1133_v4 }
 0x1e1   :  { %v230_v7 = vrot.slane %v229_v5, 4 }
 0x1e2   :  { %v237_v8 = vsel %vm133_vm2, %v236_v6, 0.0 }
 0x1e3   :  { %v231_v9 = vadd.f32 %v230_v7, %v229_v5  ;;  %v238_v10 = vrot.slane %v237_v8, 4 }
 0x1e5   :  { %v232_v11 = vrot.slane %v231_v9, 2  ;;  %v239_v12 = vadd.f32 %v238_v10, %v237_v8 }
 0x1e7   :  { %v233_v13 = vadd.f32 %v232_v11, %v231_v9  ;;  %v240_v14 = vrot.slane %v239_v12, 2 }
 0x1e9   :  { %v234_v20 = vrot.slane %v233_v13, 1  ;;  %v241_v21 = vadd.f32 %v240_v14, %v239_v12 }
 0x1eb   :  { %v242_v22 = vrot.slane %v241_v21, 1  ;;  %v235_v23 = vadd.f32 %v234_v20, %v233_v13 }
 0x1ed   :  { %v243_v24 = vadd.f32 %v242_v22, %v241_v21 }
 0x1ef   :  { %v244_v25 = vsel %vm149_vm3, %v235_v23, %v243_v24 }
 0x1f0   :  { %912 = vmatmul.msk.f32.vlgmr.msra.gmra.mxu3 %vm151_vm4, %v244_v25 }
 0x273   :  { %v268_v26 = vpop.f32.mrf.mxu3 }
 0x274   :  { %v271_v28 = vmul.f32 %v268_v26, %v268_v26  ;;  %v276_v16 = vperm.slane %v268_v26, 0 }
 0x276   :  { %v273_v30 = vrot.slane %v271_v28, 7  ;;  %v277_v48 = vsub.f32 %v1133_v4, %v276_v16 }
 0x278   :  { %v275_v32 = vsub.f32 %v268_v26, %v273_v30 }
 0x27a   :  { %v278_v34 = vadd.f32 1e-05, %v275_v32 }
 0x27c   :  { %967 = vrsqrt.f32 %v278_v34  ;;  %vm285_vm9 = vweird.f32 %v278_v34 }
 0x282   :  { %v968_v41 = vpop.eup %967 }
 0x283   :  { %v280_v42 = vmul.f32 %v968_v41, %v278_v34  ;;  %vm286_vm8 = vweird.f32 %v968_v41  ;;  %v432_v34 = vpop.permute.xlu0 %431 }
 0x284   :  { %vm287_vm10 = vmor %vm285_vm9, %vm286_vm8  ;;  %vm536_vm9 = vcmask 25600  }
 0x285   :  { %v281_v15 = vmul.f32 %v968_v41, %v280_v42 }
 0x287   :  { %v282_v45 = vmul.f32 0.5, %v281_v15 }
 0x289   :  { %v283_v46 = vsub.f32 1.5, %v282_v45 }
 0x28b   :  { %v284_v47 = vmul.f32 %v968_v41, %v283_v46 }
 0x28d   :  { %v288_v17 = vsel %vm287_vm10, %v968_v41, %v284_v47 }
 0x28e   :  { %v289_v49 = vperm.slane %v288_v17, 1 }
 0x290   :  { %v290_v51 = vmul.f32 %v289_v49, %v277_v48 }
 0x292   :  { %v292_v52 = vmul.f32 %v955_v50, %v290_v51 }
 0x294   :  { %v294_v53 = vadd.f32 %v956_v18, %v292_v52 }
 0x296   :  { %969 = vtanh.f32 %v294_v53 }
 0x297   :  { %971 = vrcp.f32 %v1072_v56 }
 0x29c   :  { %v970_v19 = vpop.eup %969 }
 0x29d   :  { %296 = vst.msk [vmem:[#allocation7 + $0x2] sm:$0x3] %vm133_vm2, %v970_v19  ;;  %914 = vmatmul.msk.f32.vlgmr.msrb.gmra.mxu1 %vm151_vm4, %v970_v19  ;;  %v972_v57 = vpop.eup %971 }
 0x29e   :  { %v394_v58 = vmul.f32 2.0, %v972_v57  ;;  %vm398_vm13 = vweird.f32 %v972_v57 }
 0x2a0   :  { %v395_v59 = vsub.f32 1.0, %v394_v58 }
 0x2a2   :  { %v396_v0 = vmul.f32 %v972_v57, %v395_v59 }
 0x2a4   :  { %v397_v3 = vadd.f32 %v972_v57, %v396_v0 }
 0x2a6   :  { %v399_v6 = vsel %vm398_vm13, %v972_v57, %v397_v3 }
 0x31a   :  { %v320_v60 = vpop.f32.mrf.mxu1 }
 0x31b   :  { %v323_v61 = vmul.f32 %v320_v60, %v320_v60  ;;  %v386_v62 = vsel %vm385_vm11, %v320_v60, 0.0  ;;  %v1172_v41 = vmul.f32 0.11111111, %v320_v60 }
 0x31c   :  { %v387_v63 = vrot.slane %v386_v62, 4 }
 0x31d   :  { %916 = vmatmul.msk.f32.vlgmr.msrb.gmra.mxu2 %vm324_vm12, %v323_v61  ;;  %v558_v43 = vrot.slane %v1172_v41, 2 }
 0x31e   :  { %v388_v1 = vadd.f32 %v387_v63, %v386_v62 }
 0x320   :  { %v389_v2 = vrot.slane %v388_v1, 2 }
 0x322   :  { %v390_v4 = vadd.f32 %v389_v2, %v388_v1 }
 0x324   :  { %v391_v5 = vrot.slane %v390_v4, 1 }
 0x326   :  { %v392_v7 = vadd.f32 %v391_v5, %v390_v4 }
 0x328   :  { %v400_v8 = vmul.f32 %v399_v6, %v392_v7 }
 0x32a   :  { %v401_v9 = vsub.f32 %v320_v60, %v400_v8 }
 0x32c   :  { %v402_v10 = vmul.f32 %v401_v9, %v401_v9 }
 0x32e   :  { %v403_v11 = vsel %vm385_vm11, %v402_v10, 0.0 }
 0x32f   :  { %v404_v12 = vrot.slane %v403_v11, 4 }
 0x331   :  { %v405_v13 = vadd.f32 %v404_v12, %v403_v11 }
 0x333   :  { %v406_v14 = vrot.slane %v405_v13, 2 }
 0x335   :  { %v407_v20 = vadd.f32 %v406_v14, %v405_v13 }
 0x337   :  { %v408_v21 = vrot.slane %v407_v20, 1 }
 0x339   :  { %v409_v22 = vadd.f32 %v408_v21, %v407_v20 }
 0x33b   :  { %v410_v23 = vmul.f32 %v409_v22, %v399_v6 }
 0x33d   :  { %v411_v24 = vadd.f32 1e-05, %v410_v23 }
 0x33f   :  { %973 = vrsqrt.f32 %v411_v24  ;;  %vm418_vm15 = vweird.f32 %v411_v24 }
 0x345   :  { %v974_v25 = vpop.eup %973 }
 0x346   :  { %v413_v26 = vmul.f32 %v974_v25, %v411_v24  ;;  %vm419_vm14 = vweird.f32 %v974_v25 }
 0x347   :  { %vm420_vm1 = vmor %vm418_vm15, %vm419_vm14 }
 0x348   :  { %v414_v28 = vmul.f32 %v974_v25, %v413_v26 }
 0x34a   :  { %v415_v29 = vmul.f32 0.5, %v414_v28 }
 0x34c   :  { %v416_v30 = vsub.f32 1.5, %v415_v29 }
 0x34e   :  { %v417_v31 = vmul.f32 %v974_v25, %v416_v30 }
 0x350   :  { %v421_v32 = vsel %vm420_vm1, %v974_v25, %v417_v31 }
 0x351   :  { %v422_v33 = vmul.f32 %v421_v32, %v401_v9 }
 0x353   :  { %v428_v35 = vmul.f32 %v426_v27, %v422_v33 }
 0x355   :  { %v1155_v36 = vadd.f32 %v432_v34, %v428_v35  ;;  %v1077_v35 = vmov 0.0  }
 0x357   :  { %436 = vrot.lane.b32.xlu1 %v1155_v36, %s1073_s1  ;;  %vm507_vm5 = vcmp.lt.f32.partialorder %v1155_v36, 0.0  ;;  %vm508_vm6 = vcmp.ge.f32.partialorder %v1155_v36, 0.0 }
 0x358   :  { %v524_v38 = vsel %vm507_vm5, 1, %v1074_v37  ;;  %v509_v39 = vsel %vm508_vm6, 1, %v1074_v37 }
 0x359   :  { %525 = vrot.lane.b32.xlu0 %v524_v38, %s1075_s21 }
 0x35f   :  { %510 = vrot.lane.b32.xlu1 %v509_v39, %s1075_s21 }
 0x3a0   :  { %v1167_v40 = vpop.f32.mrf.mxu2 }
 0x3a1   :  { %975 = vrsqrt.f32 %v1167_v40  ;;  %352 = vrot.lane.b32.xlu1 %v1167_v40, %s1073_s1  ;;  %vm377_vm7 = vcmp.eq.f32.partialorder %v1167_v40, inf  ;;  %v380_v17 = vand.u32 2147483648, %v1167_v40  ;;  %vm379_vm8 = vcmp.eq.f32.partialorder %v1167_v40, 0.0 }
 0x3a7   :  { %v976_v42 = vpop.eup %975 }
 0x3a8   :  { %v371_v44 = vmul.f32 %v976_v42, %v1167_v40 }
 0x3a9   :  { %559 = vrot.lane.b32.xlu1 %v558_v43, %s1076_s22 }
 0x3aa   :  { %v372_v15 = vmul.f32 %v976_v42, %v371_v44 }
 0x3ac   :  { %v373_v45 = vmul.f32 0.5, %v372_v15 }
 0x3ae   :  { %v374_v46 = vsub.f32 1.5, %v373_v45 }
 0x3b0   :  { %v375_v16 = vmul.f32 %v976_v42, %v374_v46 }
 0x3b2   :  { %v376_v47 = vmul.f32 %v375_v16, %v1167_v40 }
 0x3b4   :  { %v378_v48 = vsel %vm377_vm7, %v1167_v40, %v376_v47 }
 0x3b5   :  { %v381_v49 = vsel %vm379_vm8, %v380_v17, %v378_v48 }
 0x3b6   :  { %v382_v50 = vmul.f32 2.0, %v381_v49 }
 0x3b8   :  { %v383_v51 = vmul.f32 0.11111111, %v382_v50 }
 0x3ba   :  { %v554_v18 = vrot.slane %v383_v51, 4  ;;  %543 = vst.msk [vmem:[#allocation7 + $0xa] sm:$0x3] %vm536_vm9, %v383_v51 }
 0x3bc   :  { %555 = vrot.lane.b32.xlu0 %v554_v18, %s1073_s1 }
 0x3c9   :  { %v437_v52 = vpop.permute.xlu1 %436 }
 0x3ca   :  { %977 = vrcp.f32 %v437_v52  ;;  %v450_v55 = vand.u32 2147483648, %v437_v52  ;;  %v448_v57 = vand.u32 2147483647, %v437_v52  ;;  %vm444_vm11 = vweird.f32 %v437_v52 }
 0x3cc   :  { %v451_v59 = vor.u32 1.1754944e-38, %v450_v55  ;;  %vm449_vm13 = vcmp.eq.f32.partialorder %v448_v57, 8.507059e+37 }
 0x3d0   :  { %v978_v53 = vpop.eup %977 }
 0x3d1   :  { %v440_v19 = vmul.f32 %v978_v53, %v437_v52  ;;  %vm445_vm10 = vweird.f32 %v978_v53  ;;  %v511_v47 = vpop.permute.xlu1 %510 }
 0x3d2   :  { %vm446_vm12 = vmor %vm444_vm11, %vm445_vm10 }
 0x3d3   :  { %v441_v54 = vsub.f32 1.0, %v440_v19 }
 0x3d5   :  { %v442_v56 = vmul.f32 %v978_v53, %v441_v54 }
 0x3d7   :  { %v443_v58 = vadd.f32 %v978_v53, %v442_v56 }
 0x3d9   :  { %v447_v60 = vsel %vm446_vm12, %v978_v53, %v443_v58 }
 0x3da   :  { %v452_v61 = vsel %vm449_vm13, %v451_v59, %v447_v60  ;;  %v526_v60 = vpop.permute.xlu0 %525 }
 0x3db   :  { %v453_v62 = vmul.f32 %v452_v61, %v1155_v36 }
 0x3dd   :  { %v454_v63 = vand.u32 2147483647, %v453_v62 }
 0x3df   :  { %979 = vrcp.f32 %v454_v63  ;;  %v475_v0 = vadd.f32 1.0, %v454_v63  ;;  %v470_v8 = vand.u32 2147483648, %v454_v63  ;;  %vm464_vm15 = vweird.f32 %v454_v63 }
 0x3e0   :  { %vm469_vm8 = vcmp.eq.f32.partialorder %v454_v63, 8.507059e+37  ;;  %v917_v23 = vadd.f32 -1.0, %v454_v63  ;;  %vm456_vm12 = vcmp.gt.f32.partialorder %v454_v63, 0.41421357  ;;  %vm455_vm13 = vcmp.gt.f32.partialorder %v454_v63, 2.4142137 }
 0x3e1   :  { %981 = vrcp.f32 %v475_v0  ;;  %v487_v10 = vand.u32 2147483648, %v475_v0  ;;  %v485_v12 = vand.u32 2147483647, %v475_v0  ;;  %v471_v14 = vor.u32 1.1754944e-38, %v470_v8 }
 0x3e2   :  { %vm481_vm7 = vweird.f32 %v475_v0  ;;  %v457_v38 = vsel %vm456_vm12, 0.7853982, %v1077_v35  ;;  %v1082_v35 = vmov 2475754826  }
 0x3e3   :  { %v488_v21 = vor.u32 1.1754944e-38, %v487_v10  ;;  %vm486_vm11 = vcmp.eq.f32.partialorder %v485_v12, 8.507059e+37  ;;  %v458_v44 = vsel %vm455_vm13, 1.5707964, %v457_v38  ;;  %v959_v12 = vld [vmem:[#allocation5 + $0x1a8] ss:$0 sm:$0xff] }
 0x3e5   :  { %v980_v1 = vpop.eup %979 }
 0x3e6   :  { %v460_v2 = vmul.f32 %v980_v1, %v454_v63  ;;  %vm465_vm14 = vweird.f32 %v980_v1 }
 0x3e7   :  { %v982_v4 = vpop.eup %981  ;;  %vm466_vm1 = vmor %vm464_vm15, %vm465_vm14  ;;  %vm504_vm14 = vcmp.lt.f32.partialorder %v453_v62, 0.0 }
 0x3e8   :  { %v461_v3 = vsub.f32 1.0, %v460_v2  ;;  %v477_v6 = vmul.f32 %v982_v4, %v475_v0  ;;  %vm482_vm6 = vweird.f32 %v982_v4 }
 0x3e9   :  { %vm483_vm10 = vmor %vm481_vm7, %vm482_vm6 }
 0x3ea   :  { %v462_v5 = vmul.f32 %v980_v1, %v461_v3  ;;  %v478_v9 = vsub.f32 1.0, %v477_v6 }
 0x3ec   :  { %v463_v7 = vadd.f32 %v980_v1, %v462_v5  ;;  %v479_v11 = vmul.f32 %v982_v4, %v478_v9 }
 0x3ee   :  { %v467_v13 = vsel %vm466_vm1, %v980_v1, %v463_v7  ;;  %v480_v20 = vadd.f32 %v982_v4, %v479_v11 }
 0x3ef   :  { %v472_v22 = vsel %vm469_vm8, %v471_v14, %v467_v13  ;;  %vm512_vm8 = vcmp.ne.s32.totalorder %v511_v47, 0 }
 0x3f0   :  { %v484_v24 = vsel %vm483_vm10, %v982_v4, %v480_v20  ;;  %v473_v27 = vmul.f32 -1.0, %v472_v22  ;;  %vm527_vm10 = vcmp.ne.s32.totalorder %v526_v60, 0  ;;  %v100_v4 = vld [vmem:[#allocation5 + $0x1a0] sm:$0xf] }
 0x3f1   :  { %v489_v25 = vsel %vm486_vm11, %v488_v21, %v484_v24  ;;  %vm513_vm11 = vmand %vm507_vm5, %vm512_vm8  ;;  %921 = vmatpush.msk.msrb.mxu3 %vm109_vm0, %v100_v4 }
 0x3f2   :  { %v490_v26 = vmul.f32 %v917_v23, %v489_v25 }
 0x3f4   :  { %v491_v28 = vsel %vm456_vm12, %v490_v26, %v454_v63  ;;  %vm528_vm12 = vmand %vm507_vm5, %vm527_vm10  ;;  %vm570_vm5 = vcmask 31744  }
 0x3f5   :  { %v492_v29 = vsel %vm455_vm13, %v473_v27, %v491_v28  ;;  %vm562_vm13 = vcmask 1041408  }
 0x3f6   :  { %v493_v30 = vmul.f32 %v492_v29, %v492_v29  ;;  %v500_v15 = vadd.f32 %v492_v29, %v458_v44 }
 0x3f8   :  { %v494_v31 = vmul.f32 0.080537446, %v493_v30  ;;  %v501_v43 = vmul.f32 %v493_v30, %v492_v29 }
 0x3fa   :  { %v918_v32 = vadd.f32 -0.13877685, %v494_v31 }
 0x3fc   :  { %v496_v33 = vmul.f32 %v918_v32, %v493_v30 }
 0x3fe   :  { %v497_v34 = vadd.f32 0.19977711, %v496_v33  ;;  %v1081_v33 = vmov 683565275  }
 0x400   :  { %v498_v39 = vmul.f32 %v497_v34, %v493_v30 }
 0x402   :  { %v919_v42 = vadd.f32 -0.3333295, %v498_v39 }
 0x404   :  { %v502_v45 = vmul.f32 %v919_v42, %v501_v43  ;;  %v1083_v42 = vmov 2131351028  }
 0x406   :  { %v503_v46 = vadd.f32 %v502_v45, %v500_v15  ;;  %v1084_v15 = vmov 2102212464  }
 0x408   :  { %v505_v16 = vsub.f32 0.0, %v503_v46 }
 0x40a   :  { %v506_v17 = vsel %vm504_vm14, %v505_v16, %v503_v46  ;;  %vm565_vm14 = vcmask 1045504   ;;  %v1085_v16 = vmov 920167782  }
 0x40b   :  { %v514_v48 = vadd.f32 3.1415927, %v506_v17 }
 0x40d   :  { %516 = vrot.lane.b32.xlu2 %v514_v48, %s1075_s21  ;;  %v1086_v48 = vmov 1326507024  }
 0x413   :  { %v353_v49 = vpop.permute.xlu1 %352 }
 0x414   :  { %983 = vrcp.f32 %v353_v49  ;;  %v366_v52 = vand.u32 2147483648, %v353_v49  ;;  %v364_v19 = vand.u32 2147483647, %v353_v49  ;;  %vm360_vm1 = vweird.f32 %v353_v49 }
 0x415   :  { %520 = vrot.lane.b32.xlu2 %v506_v17, %s1075_s21 }
 0x416   :  { %v367_v55 = vor.u32 1.1754944e-38, %v366_v52  ;;  %vm365_vm7 = vcmp.eq.f32.partialorder %v364_v19, 8.507059e+37 }
 0x41a   :  { %v984_v50 = vpop.eup %983 }
 0x41b   :  { %v356_v51 = vmul.f32 %v984_v50, %v353_v49  ;;  %vm361_vm15 = vweird.f32 %v984_v50  ;;  %v560_v2 = vpop.permute.xlu1 %559 }
 0x41c   :  { %vm362_vm6 = vmor %vm360_vm1, %vm361_vm15 }
 0x41d   :  { %v357_v18 = vsub.f32 1.0, %v356_v51 }
 0x41f   :  { %v358_v53 = vmul.f32 %v984_v50, %v357_v18 }
 0x421   :  { %v359_v54 = vadd.f32 %v984_v50, %v358_v53 }
 0x423   :  { %v363_v56 = vsel %vm362_vm6, %v984_v50, %v359_v54 }
 0x424   :  { %v368_v57 = vsel %vm365_vm7, %v367_v55, %v363_v56 }
 0x425   :  { %v369_v58 = vmul.f32 %v368_v57, %v1167_v40 }
 0x427   :  { %539 = vrot.lane.b32.xlu1 %v369_v58, %s1075_s21 }
 0x42e   :  { %v556_v6 = vpop.permute.xlu0 %555 }
 0x467   :  { %v517_v59 = vpop.permute.xlu2 %516 }
 0x46f   :  { %v521_v61 = vpop.permute.xlu2 %520 }
 0x470   :  { %v523_v62 = vsel %vm513_vm11, %v517_v59, %v521_v61 }
 0x471   :  { %v920_v63 = vadd.f32 -3.1415927, %v523_v62 }
 0x473   :  { %v530_v0 = vsel %vm528_vm12, %v920_v63, %v523_v62 }
 0x474   :  { %v531_v1 = vmul.f32 0.15915494, %v530_v0 }
 0x476   :  { %533 = vrot.lane.b32.xlu0 %v531_v1, %s1078_s23  ;;  %v549_v40 = vrot.slane %v531_v1, 6 }
 0x478   :  { %550 = vrot.lane.b32.xlu2 %v549_v40, %s1079_s24 }
 0x499   :  { %v540_v3 = vpop.permute.xlu1 %539 }
 0x49a   :  { %542 = vst.msk [vmem:[#allocation7 + $0x8] sm:$0x3] %vm536_vm9, %v540_v3 }
 0x4d2   :  { %v551_v5 = vpop.permute.xlu2 %550 }
 0x4d3   :  { %v563_v36 = vsel %vm562_vm13, %v369_v58, %v551_v5 }
 0x4d4   :  { %v564_v7 = vsel %vm109_vm0, %v563_v36, %v556_v6 }
 0x4d5   :  { %v566_v8 = vsel %vm565_vm14, %v564_v7, %v560_v2 }
 0x4d6   :  { %568 = vrot.lane.b32.xlu2 %v566_v8, %s1075_s21 }
 0x4de   :  { %545 = vrot.lane.b32.xlu2 %v1172_v41, %s1080_s25 }
 0x4e8   :  { %v534_v9 = vpop.permute.xlu0 %533 }
 0x4e9   :  { %537 = vst.msk [vmem:[#allocation7 + $0x6] sm:$0x3] %vm536_vm9, %v534_v9 }
 0x530   :  { %v569_v10 = vpop.permute.xlu2 %568 }
 0x531   :  { %922 = vmatmul.msk.f32.vlgmr.msrb.gmra.mxu3 %vm570_vm5, %v569_v10 }
 0x538   :  { %v546_v11 = vpop.permute.xlu2 %545 }
 0x539   :  { %548 = vst.msk [vmem:[#allocation7 + $0xc] sm:$0x3] %vm536_vm9, %v546_v11 }
 0x5b4   :  { %v1199_v13 = vpop.f32.mrf.mxu3 }
 0x5b5   :  { %v597_v14 = vmul.f32 %v959_v12, %v1199_v13  ;;  %v599_v20 = vrot.slane %v1199_v13, 2 }
 0x5b7   :  { %v601_v21 = vadd.f32 %v599_v20, %v597_v14 }
 0x5b9   :  { %v1205_v41 = vmul.f32 6.2831855, %v601_v21 }
 0x5bb   :  { %v606_v22 = vand.u32 2139095040, %v1205_v41  ;;  %v603_v25 = vand.u32 2147483647, %v1205_v41 }
 0x5bd   :  { %v607_v23 = vshrl.u32 %v606_v22, 23  ;;  %v610_v27 = vand.u32 8388607, %v603_v25 }
 0x5bf   :  { %v923_v24 = vadd.s32 4294967169, %v607_v23  ;;  %v611_v31 = vor.u32 8388608, %v610_v27 }
 0x5c1   :  { %v613_v26 = vadd.s32 1, %v923_v24  ;;  %v1222_v19 = vshll.u32 %v611_v31, 8 }
 0x5c3   :  { %vm614_vm9 = vcmp.gt.s32.totalorder %v613_v26, 0  ;;  %v652_v62 = vand.u32 65535, %v1222_v19  ;;  %v653_v63 = vshrl.u32 %v1222_v19, 16 }
 0x5c4   :  { %v615_v28 = vsel %vm614_vm9, %v613_v26, 0  ;;  %vm605_vm9 = vcmp.lt.s32.totalorder %v1205_v41, 0 }
 0x5c5   :  { %v617_v29 = vand.u32 31, %v615_v28  ;;  %v1213_v32 = vshrl.u32 %v615_v28, 5 }
 0x5c7   :  { %v1211_v30 = vsub.s32 32, %v617_v29  ;;  %v620_v34 = vshll.u32 %v1081_v33, %v617_v29  ;;  %v623_v38 = vshll.u32 %v1082_v35, %v617_v29  ;;  %v626_v44 = vshll.u32 %v1083_v42, %v617_v29 }
 0x5c8   :  { %v629_v46 = vshll.u32 %v1084_v15, %v617_v29  ;;  %v632_v17 = vshll.u32 %v1085_v16, %v617_v29  ;;  %vm635_vm15 = vcmp.lt.s32.totalorder %v1213_v32, 1  ;;  %vm638_vm1 = vcmp.lt.s32.totalorder %v1213_v32, 4 }
 0x5c9   :  { %v621_v39 = vshrl.u32 %v1082_v35, %v1211_v30  ;;  %v624_v43 = vshrl.u32 %v1083_v42, %v1211_v30  ;;  %v627_v45 = vshrl.u32 %v1084_v15, %v1211_v30  ;;  %v630_v47 = vshrl.u32 %v1085_v16, %v1211_v30 }
 0x5ca   :  { %v633_v49 = vshrl.u32 %v1086_v48, %v1211_v30  ;;  %vm637_vm6 = vcmp.lt.s32.totalorder %v1213_v32, 3  ;;  %vm636_vm7 = vcmp.lt.s32.totalorder %v1213_v32, 2  ;;  %v619_v31 = vshrl.u32 %v1081_v33, %v1211_v30 }
 0x5cb   :  { %v622_v50 = vor.u32 %v621_v39, %v620_v34  ;;  %v625_v51 = vor.u32 %v624_v43, %v623_v38  ;;  %v628_v18 = vor.u32 %v627_v45, %v626_v44  ;;  %v631_v52 = vor.u32 %v630_v47, %v629_v46 }
 0x5cc   :  { %v634_v53 = vor.u32 %v633_v49, %v632_v17 }
 0x5cd   :  { %v643_v54 = vsel %vm635_vm15, %v622_v50, %v625_v51  ;;  %v647_v55 = vsel %vm635_vm15, %v625_v51, %v628_v18  ;;  %v644_v56 = vsel %vm638_vm1, %v631_v52, 920167782  ;;  %v640_v27 = vsel %vm638_vm1, %v628_v18, 2102212464 }
 0x5ce   :  { %v648_v57 = vsel %vm638_vm1, %v634_v53, 1326507024  ;;  %v645_v58 = vsel %vm637_vm6, %v628_v18, %v644_v56  ;;  %v639_v43 = vsel %vm635_vm15, %v619_v31, %v622_v50  ;;  %v641_v44 = vsel %vm637_vm6, %v625_v51, %v640_v27 }
 0x5cf   :  { %v649_v59 = vsel %vm637_vm6, %v631_v52, %v648_v57  ;;  %v646_v60 = vsel %vm636_vm7, %v643_v54, %v645_v58  ;;  %v642_v30 = vsel %vm636_vm7, %v639_v43, %v641_v44  ;;  %vm604_vm15 = vcmp.le.f32.partialorder %v603_v25, 0.7853982 }
 0x5d0   :  { %v650_v61 = vsel %vm636_vm7, %v647_v55, %v649_v59  ;;  %v676_v40 = vand.u32 65535, %v646_v60  ;;  %v677_v2 = vshrl.u32 %v646_v60, 16  ;;  %v696_v48 = vmul.u32 %v1222_v19, %v642_v30 }
 0x5d1   :  { %v654_v0 = vand.u32 65535, %v650_v61  ;;  %v655_v1 = vshrl.u32 %v650_v61, 16 }
 0x5d2   :  { %v679_v5 = vmul.u32 %v677_v2, %v652_v62  ;;  %v680_v6 = vmul.u32 %v676_v40, %v653_v63  ;;  %v678_v9 = vmul.u32 %v676_v40, %v652_v62  ;;  %v681_v14 = vmul.u32 %v677_v2, %v653_v63  ;;  %v75_v2 = vld [vmem:[#allocation5 + $0x100] sm:$0xff] }
 0x5d3   :  { %v657_v3 = vmul.u32 %v655_v1, %v652_v62  ;;  %v658_v4 = vmul.u32 %v654_v0, %v653_v63  ;;  %v656_v36 = vmul.u32 %v654_v0, %v652_v62  ;;  %v659_v8 = vmul.u32 %v655_v1, %v653_v63  ;;  %v76_v1 = vld [vmem:[#allocation5 + $0x108] sm:$0xf] }
 0x5d4   :  { %v682_v10 = vshll.u32 %v679_v5, 16  ;;  %v684_v22 = vshll.u32 %v680_v6, 16  ;;  %v683_v39 = vshrl.u32 %v679_v5, 16  ;;  %v685_v46 = vshrl.u32 %v680_v6, 16  ;;  %926 = vmatpush.msk.msra.mxu3 %vm109_vm0, %v76_v1  ;;  %v74_v5 = vld [vmem:[#allocation5 + $0xf8] sm:$0xff]  ;;  %v79_v1 = vld [vmem:[#allocation5 + $0x120] sm:$0xff] }
 0x5d5   :  { %v660_v7 = vshll.u32 %v657_v3, 16  ;;  %v662_v11 = vshll.u32 %v658_v4, 16  ;;  %v661_v34 = vshrl.u32 %v657_v3, 16  ;;  %v663_v15 = vshrl.u32 %v658_v4, 16 }
 0x5d6   :  { %vm686_vm10 = vc.u32 %v678_v9, %v682_v10  ;;  %v688_v23 = vadd.s32 %v682_v10, %v678_v9  ;;  %787 = vmatpush.msra.mxu3 %v75_v2  ;;  %v78_v2 = vld [vmem:[#allocation5 + $0x118] sm:$0xff] }
 0x5d7   :  { %vm664_vm8 = vc.u32 %v656_v36, %v660_v7  ;;  %v666_v12 = vadd.s32 %v660_v7, %v656_v36  ;;  %v687_v26 = vsel %vm686_vm10, 1, %v1074_v37  ;;  %v73_v36 = vld [vmem:[#allocation5 + $0xf0] sm:$0xff]  ;;  %v72_v7 = vld [vmem:[#allocation5 + $0xe8] sm:$0xff] }
 0x5d8   :  { %v665_v21 = vsel %vm664_vm8, 1, %v1074_v37  ;;  %v689_v29 = vadd.s32 %v687_v26, %v681_v14  ;;  %vm690_vm12 = vc.u32 %v688_v23, %v684_v22  ;;  %v692_v17 = vadd.s32 %v688_v23, %v684_v22  ;;  %788 = vmatpush.msra.mxu3 %v74_v5 }
 0x5d9   :  { %v667_v24 = vadd.s32 %v665_v21, %v659_v8  ;;  %vm668_vm11 = vc.u32 %v666_v12, %v662_v11  ;;  %v691_v38 = vsel %vm690_vm12, 1, %v1074_v37  ;;  %vm746_vm8 = vweird.f32 %v1205_v41 }
 0x5da   :  { %v669_v28 = vsel %vm668_vm11, 1, %v1074_v37  ;;  %v693_v42 = vadd.s32 %v691_v38, %v689_v29  ;;  %789 = vmatpush.msra.mxu3 %v73_v36 }
 0x5db   :  { %v671_v35 = vadd.s32 %v669_v28, %v667_v24 }
 0x5dc   :  { %v694_v16 = vadd.s32 %v693_v42, %v683_v39  ;;  %790 = vmatpush.msra.mxu3 %v72_v7 }
 0x5dd   :  { %v672_v45 = vadd.s32 %v671_v35, %v661_v34 }
 0x5de   :  { %v695_v33 = vadd.s32 %v694_v16, %v685_v46 }
 0x5df   :  { %v673_v47 = vadd.s32 %v672_v45, %v663_v15 }
 0x5e0   :  { %v699_v37 = vadd.s32 1, %v695_v33 }
 0x5e1   :  { %vm698_vm13 = vc.u32 %v673_v47, %v692_v17  ;;  %v697_v32 = vadd.s32 %v692_v17, %v673_v47 }
 0x5e2   :  { %v700_v49 = vsel %vm698_vm13, %v699_v37, %v695_v33 }
 0x5e3   :  { %v701_v18 = vadd.s32 %v700_v49, %v696_v48 }
 0x5e5   :  { %v702_v50 = vadd.s32 536870912, %v701_v18 }
 0x5e7   :  { %v703_v52 = vshrl.u32 %v702_v50, 30 }
 0x5e9   :  { %v704_v53 = vshll.u32 %v703_v52, 30  ;;  %v727_v10 = vsub.s32 4, %v703_v52 }
 0x5eb   :  { %v705_v51 = vsub.s32 %v701_v18, %v704_v53  ;;  %v728_v22 = vsel %vm605_vm9, %v727_v10, %v703_v52 }
 0x5ec   :  { %v730_v26 = vsel %vm604_vm15, 0, %v728_v22 }
 0x5ed   :  { %vm706_vm14 = vcmp.lt.s32.totalorder %v705_v51, 0  ;;  %v707_v54 = vsub.s32 0, %v705_v51  ;;  %v747_v34 = vadd.s32 3, %v730_v26 }
 0x5ef   :  { %v708_v55 = vsel %vm706_vm14, %v707_v54, %v705_v51  ;;  %v748_v42 = vand.u32 3, %v747_v34 }
 0x5f0   :  { %v709_v56 = vclz %v708_v55 }
 0x5f1   :  { %vm750_vm1 = vcmp.eq.s32.totalorder %v748_v42, 0  ;;  %vm753_vm6 = vcmp.eq.s32.totalorder %v748_v42, 2  ;;  %vm749_vm7 = vcmp.lt.s32.totalorder %v748_v42, 2 }
 0x5f2   :  { %v924_v57 = vadd.s32 4294967294, %v709_v56 }
 0x5f4   :  { %vm925_vm5 = vcmp.lt.s32.totalorder %v924_v57, 0 }
 0x5f5   :  { %v712_v58 = vsel %vm925_vm5, 0, %v924_v57 }
 0x5f6   :  { %v713_v59 = vsub.s32 32, %v712_v58  ;;  %v717_v60 = vsub.s32 4294967266, %v712_v58  ;;  %v714_v61 = vshll.u32 %v705_v51, %v712_v58 }
 0x5f8   :  { %v715_v62 = vshrl.u32 %v697_v32, %v713_v59  ;;  %v718_v63 = vadd.s32 127, %v717_v60 }
 0x5fa   :  { %v716_v19 = vor.u32 %v715_v62, %v714_v61  ;;  %v719_v0 = vshll.u32 %v718_v63, 23  ;;  %v81_v63 = vld [vmem:[#allocation5 + $0x130] sm:$0xf] }
 0x5fb   :  { %930 = vmatpush.msk.msra.mxu2 %vm109_vm0, %v81_v63 }
 0x5fc   :  { %v720_v40 = vor.u32 4788187, %v719_v0  ;;  %v723_v4 = vcvt.s32.f32 %v716_v19  ;;  %v80_v0 = vld [vmem:[#allocation5 + $0x128] sm:$0xff] }
 0x5fd   :  { %878 = vmatpush.msra.mxu2 %v80_v0 }
 0x5fe   :  { %v721_v3 = vand.u32 2147483647, %v720_v40 }
 0x5ff   :  { %879 = vmatpush.msra.mxu2 %v79_v1 }
 0x600   :  { %v724_v6 = vmul.f32 %v723_v4, %v721_v3  ;;  %v77_v4 = vld [vmem:[#allocation5 + $0x110] sm:$0xff] }
 0x601   :  { %880 = vmatpush.msra.mxu2 %v78_v2 }
 0x602   :  { %v725_v8 = vxor.u32 2147483648, %v724_v6 }
 0x603   :  { %881 = vmatpush.msra.mxu2 %v77_v4 }
 0x604   :  { %v726_v9 = vsel %vm605_vm9, %v725_v8, %v724_v6 }
 0x605   :  { %v729_v11 = vsel %vm604_vm15, %v1205_v41, %v726_v9 }
 0x606   :  { %v731_v12 = vmul.f32 %v729_v11, %v729_v11 }
 0x608   :  { %v732_v14 = vmul.f32 -0.001358992, %v731_v12  ;;  %v739_v21 = vmul.f32 -0.00019511016, %v731_v12 }
 0x60a   :  { %v733_v23 = vadd.f32 0.041655596, %v732_v14  ;;  %v740_v24 = vadd.f32 0.008332121, %v739_v21  ;;  %v960_v21 = vld [vmem:[#allocation5 + $0x19c] ss:$0 sm:$0xff] }
 0x60c   :  { %v734_v27 = vmul.f32 %v733_v23, %v731_v12  ;;  %v741_v28 = vmul.f32 %v740_v24, %v731_v12  ;;  %v961_v23 = vld [vmem:[#allocation5 + $0x19d] ss:$0 sm:$0xff] }
 0x60e   :  { %v735_v29 = vadd.f32 -0.4999988, %v734_v27  ;;  %v742_v31 = vadd.f32 -0.16666654, %v741_v28  ;;  %v962_v28 = vld [vmem:[#allocation5 + $0x1b0] ss:$0 sm:$0xff] }
 0x610   :  { %v736_v35 = vmul.f32 %v735_v29, %v731_v12  ;;  %v743_v38 = vmul.f32 %v742_v31, %v731_v12 }
 0x612   :  { %v737_v39 = vadd.f32 1.0, %v736_v35  ;;  %v744_v25 = vadd.f32 1.0, %v743_v38 }
 0x614   :  { %v745_v43 = vmul.f32 %v744_v25, %v729_v11  ;;  %v754_v44 = vxor.u32 2147483648, %v737_v39 }
 0x616   :  { %v751_v15 = vxor.u32 2147483648, %v745_v43  ;;  %v755_v46 = vsel %vm753_vm6, %v754_v44, %v745_v43 }
 0x618   :  { %v752_v45 = vsel %vm750_vm1, %v737_v39, %v751_v15 }
 0x619   :  { %v756_v16 = vsel %vm749_vm7, %v752_v45, %v755_v46 }
 0x61a   :  { %v757_v47 = vsel %vm746_vm8, nan, %v756_v16 }
 0x61b   :  { %v759_v17 = vrot.slane %v757_v47, 4 }
 0x61d   :  { %v761_v30 = vmul.f32 %v759_v17, %v1199_v13 }
 0x61f   :  { %v762_v33 = vadd.f32 %v761_v30, %v599_v20 }
 0x621   :  { %764 = vst.sshfl [vmem:[#allocation1] sm:$0xff pattern:$0x73625140] %v762_v33  ;;  %v769_v37 = vrot.slane %v762_v33, 4 }
 0x623   :  { %927 = vmatmul.msk.f32.vlgmr.msra.gmra.mxu3 %vm151_vm4, %v769_v37 }
 0x628   :  { %v766_v48 = vld [vmem:[#allocation1 + $0x2] ss:$4 sm:$0xff] }
 0x629   :  { %768 = vst.msk [vmem:[#allocation7 + $0x4] sm:$0x3] %vm133_vm2, %v766_v48 }
 0x6a6   :  { %v792_v49 = vpop.f32.mrf.mxu3 }
 0x6a7   :  { %v795_v18 = vsel %vm133_vm2, %v792_v49, 0.0  ;;  %v802_v50 = vmul.f32 %v792_v49, %v792_v49 }
 0x6a8   :  { %v796_v41 = vrot.slane %v795_v18, 4 }
 0x6a9   :  { %v803_v52 = vsel %vm133_vm2, %v802_v50, 0.0 }
 0x6aa   :  { %v797_v53 = vadd.f32 %v796_v41, %v795_v18  ;;  %v804_v51 = vrot.slane %v803_v52, 4 }
 0x6ac   :  { %v798_v54 = vrot.slane %v797_v53, 2  ;;  %v805_v55 = vadd.f32 %v804_v51, %v803_v52 }
 0x6ae   :  { %v799_v13 = vadd.f32 %v798_v54, %v797_v53  ;;  %v806_v20 = vrot.slane %v805_v55, 2 }
 0x6b0   :  { %v800_v56 = vrot.slane %v799_v13, 1  ;;  %v807_v57 = vadd.f32 %v806_v20, %v805_v55 }
 0x6b2   :  { %v808_v58 = vrot.slane %v807_v57, 1  ;;  %v801_v32 = vadd.f32 %v800_v56, %v799_v13 }
 0x6b4   :  { %v809_v59 = vadd.f32 %v808_v58, %v807_v57 }
 0x6b6   :  { %v810_v60 = vsel %vm149_vm3, %v801_v32, %v809_v59 }
 0x6b7   :  { %929 = vmatmul.msk.f32.vlgmr.msra.gmra.mxu1 %vm151_vm4, %v810_v60 }
 0x734   :  { %v831_v61 = vpop.f32.mrf.mxu1 }
 0x735   :  { %v834_v62 = vmul.f32 %v831_v61, %v831_v61  ;;  %v839_v9 = vperm.slane %v831_v61, 0 }
 0x737   :  { %v836_v19 = vrot.slane %v834_v62, 7  ;;  %v840_v12 = vsub.f32 %v792_v49, %v839_v9 }
 0x739   :  { %v838_v40 = vsub.f32 %v831_v61, %v836_v19 }
 0x73b   :  { %v841_v3 = vadd.f32 1e-05, %v838_v40 }
 0x73d   :  { %985 = vrsqrt.f32 %v841_v3  ;;  %vm848_vm0 = vweird.f32 %v841_v3 }
 0x743   :  { %v986_v5 = vpop.eup %985 }
 0x744   :  { %v843_v6 = vmul.f32 %v986_v5, %v841_v3  ;;  %vm849_vm2 = vweird.f32 %v986_v5 }
 0x745   :  { %vm850_vm3 = vmor %vm848_vm0, %vm849_vm2 }
 0x746   :  { %v844_v36 = vmul.f32 %v986_v5, %v843_v6 }
 0x748   :  { %v845_v7 = vmul.f32 0.5, %v844_v36 }
 0x74a   :  { %v846_v8 = vsub.f32 1.5, %v845_v7 }
 0x74c   :  { %v847_v10 = vmul.f32 %v986_v5, %v846_v8 }
 0x74e   :  { %v851_v11 = vsel %vm850_vm3, %v986_v5, %v847_v10 }
 0x74f   :  { %v852_v14 = vperm.slane %v851_v11, 1 }
 0x751   :  { %v853_v22 = vmul.f32 %v852_v14, %v840_v12 }
 0x753   :  { %v855_v24 = vmul.f32 %v960_v21, %v853_v22 }
 0x755   :  { %v857_v26 = vadd.f32 %v961_v23, %v855_v24 }
 0x757   :  { %987 = vtanh.f32 %v857_v26 }
 0x75d   :  { %v988_v27 = vpop.eup %987 }
 0x75e   :  { %931 = vmatmul.msk.f32.vlgmr.msra.gmra.mxu2 %vm151_vm4, %v988_v27 }
 0x7e1   :  { %v883_v29 = vpop.f32.mrf.mxu2 }
 0x7e2   :  { %v884_v31 = vadd.f32 %v962_v28, %v883_v29 }
 0x7e4   :  { %886 = vst [vmem:[#allocation7] sm:$0x3] %v884_v31 }
 0x7e5   :  { %897 = dma.vmem_to_hbm [thread:$0]  %s893_s27, 224, %s895_s30, [#allocation4]  }
 0x7e6   :  { %1065 = dma.done.wait [#allocation4], 224  }
 0x7e7   :  { %1066 = vsyncadd [#allocation4], 4294967072 }
 0x7e8   :  { %902 = vsyncpa [#allocation3], 1 }
 0x7e9   :  { %903 = vsyncpa [#allocation6], 1 }
 0x7ea   :  { %904 = vsyncpa [#allocation4], 1 }

</bundles_post_ra>
